<compile_context>
chip_gen: v7x
topology: tpu7x:2x2x1
jax: 0.10.0
libtpu: 0.0.40
codegen_flags: <defaults>
</compile_context>

<pallas_src>
import functools

import jax
import jax.numpy as jnp
from jax import lax
from jax.experimental import pallas as pl
from jax.experimental.pallas import tpu as pltpu


# -----------------------------------------------------------------------------
# Fused Pallas kernel: in-kernel im2col matmul + batch-stat accumulation + BN
# -----------------------------------------------------------------------------
def conv_bn_fused_kernel(x_ref, w_ref, gamma_ref, beta_ref, y_ref, sum_ref, ssq_ref,
                         *, kh, kw, oh, ow, stride, cin, tile_rows, m_total, eps):
    b = pl.program_id(0)

    @pl.when(b == 0)
    def _init():
        sum_ref[...] = jnp.zeros_like(sum_ref)
        ssq_ref[...] = jnp.zeros_like(ssq_ref)

    x = x_ref[0]                                   # (Hp, Wp, Cin) bf16, one image
    oc_pad = y_ref.shape[1]

    # In-kernel im2col: KH*KW shifted windows, each one MXU dot accumulated in f32.
    acc = jnp.zeros((tile_rows, oc_pad), jnp.float32)
    for i in range(kh):
        for j in range(kw):
            patch = lax.slice(
                x,
                (i, j, 0),
                (i + (oh - 1) * stride + 1, j + (ow - 1) * stride + 1, cin),
                (stride, stride, 1))               # (OH, OW, Cin)
            patch2d = patch.reshape(oh * ow, cin)  # collapse into sublane dim (OW%8==0)
            acc = acc + jnp.dot(patch2d, w_ref[i * kw + j],
                                preferred_element_type=jnp.float32)

    # Write this image's raw conv rows into the VMEM-resident output slab.
    row0 = pl.multiple_of(b * tile_rows, tile_rows)
    y_ref[pl.ds(row0, tile_rows), :] = acc

    # Per-channel batch statistics (f32).
    sum_ref[...] += jnp.sum(acc, axis=0, keepdims=True)
    ssq_ref[...] += jnp.sum(acc * acc, axis=0, keepdims=True)

    # Finalize: normalize the whole resident slab in place on the last grid step.
    @pl.when(b == pl.num_programs(0) - 1)
    def _finalize():
        mean = sum_ref[...] * (1.0 / m_total)
        var = ssq_ref[...] * (1.0 / m_total) - mean * mean   # biased (training BN)
        invstd = lax.rsqrt(var + eps)
        scale = gamma_ref[...] * invstd                      # (1, OCpad)
        shift = beta_ref[...] - mean * scale                 # (1, OCpad)
        y_ref[...] = y_ref[...] * scale + shift              # single FMA per element


# -----------------------------------------------------------------------------
# Wrapper: layout plumbing + pallas_call
# -----------------------------------------------------------------------------
@functools.partial(jax.jit, static_argnames=("stride", "pad", "eps"))
def conv_bn_forward(x_nchw, weight_ochw, gamma, beta, *, stride=1, pad=1, eps=1e-5):
    """Conv2d(bias=False) + BatchNorm2d (training mode: batch statistics)."""
    n, cin, h, w = x_nchw.shape
    oc, _, kh, kw = weight_ochw.shape
    oh = (h + 2 * pad - kh) // stride + 1
    ow = (w + 2 * pad - kw) // stride + 1
    hp, wp = h + 2 * pad, w + 2 * pad

    oc_pad = ((oc + 127) // 128) * 128             # lane-dense output channels
    tile_rows = oh * ow                            # rows produced per grid step
    m_total = n * tile_rows                        # total real rows (no M padding)

    # NCHW -> NHWC, spatial zero-pad, cast activations to bf16 (MXU-native input).
    x_nhwc = jnp.transpose(x_nchw, (0, 2, 3, 1)).astype(jnp.bfloat16)
    xp = jnp.pad(x_nhwc, ((0, 0), (pad, pad), (pad, pad), (0, 0)))

    # (OC, Cin, KH, KW) -> (KH*KW, Cin, OCpad) bf16, zero-padded extra channels.
    w_k = jnp.transpose(weight_ochw.astype(jnp.float32), (2, 3, 1, 0))
    w_k = w_k.reshape(kh * kw, cin, oc)
    w_k = jnp.pad(w_k, ((0, 0), (0, 0), (0, oc_pad - oc))).astype(jnp.bfloat16)

    gamma2d = jnp.pad(gamma.astype(jnp.float32).reshape(1, oc),
                      ((0, 0), (0, oc_pad - oc)))
    beta2d = jnp.pad(beta.astype(jnp.float32).reshape(1, oc),
                     ((0, 0), (0, oc_pad - oc)))

    # VMEM budget: resident output slab + double-buffered image/weight tiles + headroom.
    y_bytes = m_total * oc_pad * 4
    x_blk_bytes = hp * wp * cin * 2
    w_bytes = kh * kw * cin * oc_pad * 2
    assert y_bytes <= 48 * 1024 * 1024, (
        "fused BN path keeps the conv output resident in VMEM; use a tiled two-pass "
        "fallback for activations this large")
    vmem_limit = int(min(100 * 1024 * 1024,
                         max(16 * 1024 * 1024,
                             2 * (y_bytes + x_blk_bytes + w_bytes) + (2 << 20))))

    kernel = functools.partial(
        conv_bn_fused_kernel,
        kh=kh, kw=kw, oh=oh, ow=ow, stride=stride, cin=cin,
        tile_rows=tile_rows, m_total=m_total, eps=eps)

    y_flat = pl.pallas_call(
        kernel,
        out_shape=jax.ShapeDtypeStruct((m_total, oc_pad), jnp.float32),
        grid_spec=pltpu.PrefetchScalarGridSpec(
            num_scalar_prefetch=0,
            grid=(n,),
            in_specs=[
                pl.BlockSpec((1, hp, wp, cin), lambda b: (b, 0, 0, 0)),   # one image
                pl.BlockSpec((kh * kw, cin, oc_pad), lambda b: (0, 0, 0)),  # weights
                pl.BlockSpec((1, oc_pad), lambda b: (0, 0)),              # gamma
                pl.BlockSpec((1, oc_pad), lambda b: (0, 0)),              # beta
            ],
            # Constant index map -> output stays resident in VMEM across the grid.
            out_specs=pl.BlockSpec((m_total, oc_pad), lambda b: (0, 0)),
            scratch_shapes=[pltpu.VMEM((1, oc_pad), jnp.float32),   # per-channel sum
                            pltpu.VMEM((1, oc_pad), jnp.float32)],  # per-channel sumsq
        ),
        compiler_params=pltpu.CompilerParams(
            dimension_semantics=("arbitrary",),   # resident output / stats accumulation
            vmem_limit_bytes=vmem_limit),
    )(xp, w_k, gamma2d, beta2d)

    # (M, OCpad) -> slice real channels -> (N, OH, OW, OC) -> NCHW
    y = y_flat[:, :oc].reshape(n, oh, ow, oc)
    return jnp.transpose(y, (0, 3, 1, 2))


# -----------------------------------------------------------------------------
# Reference (pure JAX, f32) for a sanity check
# -----------------------------------------------------------------------------
def conv_bn_reference(x_nchw, weight_ochw, gamma, beta, *, stride=1, pad=1, eps=1e-5):
    y = lax.conv_general_dilated(
        x_nchw.astype(jnp.float32), weight_ochw.astype(jnp.float32),
        window_strides=(stride, stride), padding=((pad, pad), (pad, pad)),
        dimension_numbers=("NCHW", "OIHW", "NCHW"))
    mean = jnp.mean(y, axis=(0, 2, 3), keepdims=True)
    var = jnp.mean((y - mean) ** 2, axis=(0, 2, 3), keepdims=True)
    g = gamma.reshape(1, -1, 1, 1)
    b = beta.reshape(1, -1, 1, 1)
    return (y - mean) * lax.rsqrt(var + eps) * g + b


# -----------------------------------------------------------------------------
if __name__ == "__main__":
    key = jax.random.PRNGKey(0)
    k_x, k_w = jax.random.split(key)

    # ConvBn(in_channels=4, out_channels=8, kernel_size=3, stride=1, pad=1)
    N, CIN, H, W = 2, 4, 16, 16
    OC, KH, KW = 8, 3, 3

    x = jax.random.normal(k_x, (N, CIN, H, W), dtype=jnp.float32)
    weight = jax.random.normal(k_w, (OC, CIN, KH, KW), dtype=jnp.float32) * 0.1
    gamma = jnp.ones((OC,), dtype=jnp.float32)   # BatchNorm2d default weight init
    beta = jnp.zeros((OC,), dtype=jnp.float32)   # BatchNorm2d default bias init

    out = conv_bn_forward(x, weight, gamma, beta, stride=1, pad=1)
    out = jax.block_until_ready(out)

    ref = conv_bn_reference(x, weight, gamma, beta, stride=1, pad=1)
    assert out.shape == (N, OC, H, W), out.shape
    # Tolerance loosened slightly vs. pure-f32: the MXU matmul runs in bf16
    # (f32 accumulation and f32 batch statistics).
    max_err = float(jnp.max(jnp.abs(out - ref)))
    assert jnp.allclose(out, ref, rtol=2e-2, atol=2e-2), max_err

    print("KERNEL_OK")
</pallas_src>

<mosaic_0001>
module attributes {stable_mosaic.version = 11 : i64} {
  func.func @conv_bn_fused_kernel(%arg0: i32, %arg1: memref<1x18x18x4xbf16, #tpu.memory_space<vmem>>, %arg2: memref<9x4x128xbf16, #tpu.memory_space<vmem>>, %arg3: memref<1x128xf32, #tpu.memory_space<vmem>>, %arg4: memref<1x128xf32, #tpu.memory_space<vmem>>, %arg5: memref<512x128xf32, #tpu.memory_space<vmem>>, %arg6: memref<1x128xf32, #tpu.memory_space<vmem>>, %arg7: memref<1x128xf32, #tpu.memory_space<vmem>>) attributes {dimension_semantics = [#tpu.dimension_semantics<arbitrary>], iteration_bounds = array<i64: 2>, scalar_prefetch = 0 : i64, scratch_operands = 2 : i64, tpu.core_type = #tpu.core_type<tc>, window_params = [{transform_indices = @transform_0, window_bounds = array<i64: 1, 18, 18, 4>}, {pipeline_mode = #tpu.pipeline_mode<synchronous>, transform_indices = @transform_1, window_bounds = array<i64: 9, 4, 128>}, {pipeline_mode = #tpu.pipeline_mode<synchronous>, transform_indices = @transform_2, window_bounds = array<i64: 1, 128>}, {pipeline_mode = #tpu.pipeline_mode<synchronous>, transform_indices = @transform_3, window_bounds = array<i64: 1, 128>}, {pipeline_mode = #tpu.pipeline_mode<synchronous>, transform_indices = @transform_4, window_bounds = array<i64: 512, 128>}]} {
    %c0_i32 = arith.constant 0 : i32
    %0 = arith.cmpi eq, %arg0, %c0_i32 : i32
    %1 = arith.extui %0 : i1 to i32
    %c0_i32_0 = arith.constant 0 : i32
    %2 = arith.cmpi ne, %1, %c0_i32_0 : i32
    scf.if %2 {
      %cst_44 = arith.constant 0.000000e+00 : f32
      %78 = vector.broadcast %cst_44 : f32 to vector<1x128xf32>
      %c0_45 = arith.constant 0 : index
      %c0_46 = arith.constant 0 : index
      %79 = vector.load %arg6[%c0_45, %c0_46] : memref<1x128xf32, #tpu.memory_space<vmem>>, vector<1x128xf32>
      tpu.vector_store %arg6[%c0_45, %c0_46], %78 {strides = array<i32>} : memref<1x128xf32, #tpu.memory_space<vmem>>, vector<1x128xf32>,
      %cst_47 = arith.constant 0.000000e+00 : f32
      %80 = vector.broadcast %cst_47 : f32 to vector<1x128xf32>
      %c0_48 = arith.constant 0 : index
      %c0_49 = arith.constant 0 : index
      %81 = vector.load %arg7[%c0_48, %c0_49] : memref<1x128xf32, #tpu.memory_space<vmem>>, vector<1x128xf32>
      tpu.vector_store %arg7[%c0_48, %c0_49], %80 {strides = array<i32>} : memref<1x128xf32, #tpu.memory_space<vmem>>, vector<1x128xf32>,
    } else {
    }
    %c0 = arith.constant 0 : index
    %c0_1 = arith.constant 0 : index
    %c0_2 = arith.constant 0 : index
    %c0_3 = arith.constant 0 : index
    %3 = vector.load %arg1[%c0, %c0_1, %c0_2, %c0_3] : memref<1x18x18x4xbf16, #tpu.memory_space<vmem>>, vector<1x18x18x4xbf16>
    %4 = vector.shape_cast %3 : vector<1x18x18x4xbf16> to vector<18x18x4xbf16>
    %cst = arith.constant 0.000000e+00 : f32
    %5 = vector.broadcast %cst : f32 to vector<256x128xf32>
    %6 = vector.extract_strided_slice %4 {offsets = [0, 0, 0], sizes = [16, 16, 4], strides = [1, 1, 1]} : vector<18x18x4xbf16> to vector<16x16x4xbf16>
    %7 = vector.shape_cast %6 : vector<16x16x4xbf16> to vector<256x4xbf16>
    %c0_4 = arith.constant 0 : index
    %c0_5 = arith.constant 0 : index
    %c0_6 = arith.constant 0 : index
    %8 = vector.load %arg2[%c0_4, %c0_5, %c0_6] : memref<9x4x128xbf16, #tpu.memory_space<vmem>>, vector<1x4x128xbf16>
    %9 = vector.shape_cast %8 : vector<1x4x128xbf16> to vector<4x128xbf16>
    %cst_7 = arith.constant dense<0.000000e+00> : vector<256x128xf32>
    %10 = tpu.matmul %7, %9, %cst_7 {dimension_numbers = #tpu.dot_dimension_numbers<[1], [0], [0], [1], [0, 0, 1, 1], [], []>} : vector<256x4xbf16>, vector<4x128xbf16>, vector<256x128xf32> -> vector<256x128xf32>
    %11 = arith.addf %5, %10 : vector<256x128xf32>
    %12 = vector.extract_strided_slice %4 {offsets = [0, 1, 0], sizes = [16, 16, 4], strides = [1, 1, 1]} : vector<18x18x4xbf16> to vector<16x16x4xbf16>
    %13 = vector.shape_cast %12 : vector<16x16x4xbf16> to vector<256x4xbf16>
    %c1 = arith.constant 1 : index
    %c0_8 = arith.constant 0 : index
    %c0_9 = arith.constant 0 : index
    %14 = vector.load %arg2[%c1, %c0_8, %c0_9] : memref<9x4x128xbf16, #tpu.memory_space<vmem>>, vector<1x4x128xbf16>
    %15 = vector.shape_cast %14 : vector<1x4x128xbf16> to vector<4x128xbf16>
    %cst_10 = arith.constant dense<0.000000e+00> : vector<256x128xf32>
    %16 = tpu.matmul %13, %15, %cst_10 {dimension_numbers = #tpu.dot_dimension_numbers<[1], [0], [0], [1], [0, 0, 1, 1], [], []>} : vector<256x4xbf16>, vector<4x128xbf16>, vector<256x128xf32> -> vector<256x128xf32>
    %17 = arith.addf %11, %16 : vector<256x128xf32>
    %18 = vector.extract_strided_slice %4 {offsets = [0, 2, 0], sizes = [16, 16, 4], strides = [1, 1, 1]} : vector<18x18x4xbf16> to vector<16x16x4xbf16>
    %19 = vector.shape_cast %18 : vector<16x16x4xbf16> to vector<256x4xbf16>
    %c2 = arith.constant 2 : index
    %c0_11 = arith.constant 0 : index
    %c0_12 = arith.constant 0 : index
    %20 = vector.load %arg2[%c2, %c0_11, %c0_12] : memref<9x4x128xbf16, #tpu.memory_space<vmem>>, vector<1x4x128xbf16>
    %21 = vector.shape_cast %20 : vector<1x4x128xbf16> to vector<4x128xbf16>
    %cst_13 = arith.constant dense<0.000000e+00> : vector<256x128xf32>
    %22 = tpu.matmul %19, %21, %cst_13 {dimension_numbers = #tpu.dot_dimension_numbers<[1], [0], [0], [1], [0, 0, 1, 1], [], []>} : vector<256x4xbf16>, vector<4x128xbf16>, vector<256x128xf32> -> vector<256x128xf32>
    %23 = arith.addf %17, %22 : vector<256x128xf32>
    %24 = vector.extract_strided_slice %4 {offsets = [1, 0, 0], sizes = [16, 16, 4], strides = [1, 1, 1]} : vector<18x18x4xbf16> to vector<16x16x4xbf16>
    %25 = vector.shape_cast %24 : vector<16x16x4xbf16> to vector<256x4xbf16>
    %c3 = arith.constant 3 : index
    %c0_14 = arith.constant 0 : index
    %c0_15 = arith.constant 0 : index
    %26 = vector.load %arg2[%c3, %c0_14, %c0_15] : memref<9x4x128xbf16, #tpu.memory_space<vmem>>, vector<1x4x128xbf16>
    %27 = vector.shape_cast %26 : vector<1x4x128xbf16> to vector<4x128xbf16>
    %cst_16 = arith.constant dense<0.000000e+00> : vector<256x128xf32>
    %28 = tpu.matmul %25, %27, %cst_16 {dimension_numbers = #tpu.dot_dimension_numbers<[1], [0], [0], [1], [0, 0, 1, 1], [], []>} : vector<256x4xbf16>, vector<4x128xbf16>, vector<256x128xf32> -> vector<256x128xf32>
    %29 = arith.addf %23, %28 : vector<256x128xf32>
    %30 = vector.extract_strided_slice %4 {offsets = [1, 1, 0], sizes = [16, 16, 4], strides = [1, 1, 1]} : vector<18x18x4xbf16> to vector<16x16x4xbf16>
    %31 = vector.shape_cast %30 : vector<16x16x4xbf16> to vector<256x4xbf16>
    %c4 = arith.constant 4 : index
    %c0_17 = arith.constant 0 : index
    %c0_18 = arith.constant 0 : index
    %32 = vector.load %arg2[%c4, %c0_17, %c0_18] : memref<9x4x128xbf16, #tpu.memory_space<vmem>>, vector<1x4x128xbf16>
    %33 = vector.shape_cast %32 : vector<1x4x128xbf16> to vector<4x128xbf16>
    %cst_19 = arith.constant dense<0.000000e+00> : vector<256x128xf32>
    %34 = tpu.matmul %31, %33, %cst_19 {dimension_numbers = #tpu.dot_dimension_numbers<[1], [0], [0], [1], [0, 0, 1, 1], [], []>} : vector<256x4xbf16>, vector<4x128xbf16>, vector<256x128xf32> -> vector<256x128xf32>
    %35 = arith.addf %29, %34 : vector<256x128xf32>
    %36 = vector.extract_strided_slice %4 {offsets = [1, 2, 0], sizes = [16, 16, 4], strides = [1, 1, 1]} : vector<18x18x4xbf16> to vector<16x16x4xbf16>
    %37 = vector.shape_cast %36 : vector<16x16x4xbf16> to vector<256x4xbf16>
    %c5 = arith.constant 5 : index
    %c0_20 = arith.constant 0 : index
    %c0_21 = arith.constant 0 : index
    %38 = vector.load %arg2[%c5, %c0_20, %c0_21] : memref<9x4x128xbf16, #tpu.memory_space<vmem>>, vector<1x4x128xbf16>
    %39 = vector.shape_cast %38 : vector<1x4x128xbf16> to vector<4x128xbf16>
    %cst_22 = arith.constant dense<0.000000e+00> : vector<256x128xf32>
    %40 = tpu.matmul %37, %39, %cst_22 {dimension_numbers = #tpu.dot_dimension_numbers<[1], [0], [0], [1], [0, 0, 1, 1], [], []>} : vector<256x4xbf16>, vector<4x128xbf16>, vector<256x128xf32> -> vector<256x128xf32>
    %41 = arith.addf %35, %40 : vector<256x128xf32>
    %42 = vector.extract_strided_slice %4 {offsets = [2, 0, 0], sizes = [16, 16, 4], strides = [1, 1, 1]} : vector<18x18x4xbf16> to vector<16x16x4xbf16>
    %43 = vector.shape_cast %42 : vector<16x16x4xbf16> to vector<256x4xbf16>
    %c6 = arith.constant 6 : index
    %c0_23 = arith.constant 0 : index
    %c0_24 = arith.constant 0 : index
    %44 = vector.load %arg2[%c6, %c0_23, %c0_24] : memref<9x4x128xbf16, #tpu.memory_space<vmem>>, vector<1x4x128xbf16>
    %45 = vector.shape_cast %44 : vector<1x4x128xbf16> to vector<4x128xbf16>
    %cst_25 = arith.constant dense<0.000000e+00> : vector<256x128xf32>
    %46 = tpu.matmul %43, %45, %cst_25 {dimension_numbers = #tpu.dot_dimension_numbers<[1], [0], [0], [1], [0, 0, 1, 1], [], []>} : vector<256x4xbf16>, vector<4x128xbf16>, vector<256x128xf32> -> vector<256x128xf32>
    %47 = arith.addf %41, %46 : vector<256x128xf32>
    %48 = vector.extract_strided_slice %4 {offsets = [2, 1, 0], sizes = [16, 16, 4], strides = [1, 1, 1]} : vector<18x18x4xbf16> to vector<16x16x4xbf16>
    %49 = vector.shape_cast %48 : vector<16x16x4xbf16> to vector<256x4xbf16>
    %c7 = arith.constant 7 : index
    %c0_26 = arith.constant 0 : index
    %c0_27 = arith.constant 0 : index
    %50 = vector.load %arg2[%c7, %c0_26, %c0_27] : memref<9x4x128xbf16, #tpu.memory_space<vmem>>, vector<1x4x128xbf16>
    %51 = vector.shape_cast %50 : vector<1x4x128xbf16> to vector<4x128xbf16>
    %cst_28 = arith.constant dense<0.000000e+00> : vector<256x128xf32>
    %52 = tpu.matmul %49, %51, %cst_28 {dimension_numbers = #tpu.dot_dimension_numbers<[1], [0], [0], [1], [0, 0, 1, 1], [], []>} : vector<256x4xbf16>, vector<4x128xbf16>, vector<256x128xf32> -> vector<256x128xf32>
    %53 = arith.addf %47, %52 : vector<256x128xf32>
    %54 = vector.extract_strided_slice %4 {offsets = [2, 2, 0], sizes = [16, 16, 4], strides = [1, 1, 1]} : vector<18x18x4xbf16> to vector<16x16x4xbf16>
    %55 = vector.shape_cast %54 : vector<16x16x4xbf16> to vector<256x4xbf16>
    %c8 = arith.constant 8 : index
    %c0_29 = arith.constant 0 : index
    %c0_30 = arith.constant 0 : index
    %56 = vector.load %arg2[%c8, %c0_29, %c0_30] : memref<9x4x128xbf16, #tpu.memory_space<vmem>>, vector<1x4x128xbf16>
    %57 = vector.shape_cast %56 : vector<1x4x128xbf16> to vector<4x128xbf16>
    %cst_31 = arith.constant dense<0.000000e+00> : vector<256x128xf32>
    %58 = tpu.matmul %55, %57, %cst_31 {dimension_numbers = #tpu.dot_dimension_numbers<[1], [0], [0], [1], [0, 0, 1, 1], [], []>} : vector<256x4xbf16>, vector<4x128xbf16>, vector<256x128xf32> -> vector<256x128xf32>
    %59 = arith.addf %53, %58 : vector<256x128xf32>
    %c256_i32 = arith.constant 256 : i32
    %60 = arith.muli %arg0, %c256_i32 : i32
    %61 = tpu.assume_multiple %60, 256 : i32
    %62 = arith.index_cast %61 : i32 to index
    %c0_32 = arith.constant 0 : index
    %63 = vector.load %arg5[%62, %c0_32] : memref<512x128xf32, #tpu.memory_space<vmem>>, vector<256x128xf32>
    tpu.vector_store %arg5[%62, %c0_32], %59 {strides = array<i32>} : memref<512x128xf32, #tpu.memory_space<vmem>>, vector<256x128xf32>,
    %c0_33 = arith.constant 0 : index
    %c0_34 = arith.constant 0 : index
    %64 = vector.load %arg6[%c0_33, %c0_34] : memref<1x128xf32, #tpu.memory_space<vmem>>, vector<1x128xf32>
    %cst_35 = arith.constant dense<0.000000e+00> : vector<128xf32>
    %65 = vector.multi_reduction <add>, %59, %cst_35 [0] : vector<256x128xf32> to vector<128xf32>
    %66 = vector.shape_cast %65 : vector<128xf32> to vector<1x128xf32>
    %67 = arith.addf %64, %66 : vector<1x128xf32>
    %c0_36 = arith.constant 0 : index
    %c0_37 = arith.constant 0 : index
    %68 = vector.load %arg6[%c0_36, %c0_37] : memref<1x128xf32, #tpu.memory_space<vmem>>, vector<1x128xf32>
    tpu.vector_store %arg6[%c0_36, %c0_37], %67 {strides = array<i32>} : memref<1x128xf32, #tpu.memory_space<vmem>>, vector<1x128xf32>,
    %c0_38 = arith.constant 0 : index
    %c0_39 = arith.constant 0 : index
    %69 = vector.load %arg7[%c0_38, %c0_39] : memref<1x128xf32, #tpu.memory_space<vmem>>, vector<1x128xf32>
    %70 = arith.mulf %59, %59 : vector<256x128xf32>
    %cst_40 = arith.constant dense<0.000000e+00> : vector<128xf32>
    %71 = vector.multi_reduction <add>, %70, %cst_40 [0] : vector<256x128xf32> to vector<128xf32>
    %72 = vector.shape_cast %71 : vector<128xf32> to vector<1x128xf32>
    %73 = arith.addf %69, %72 : vector<1x128xf32>
    %c0_41 = arith.constant 0 : index
    %c0_42 = arith.constant 0 : index
    %74 = vector.load %arg7[%c0_41, %c0_42] : memref<1x128xf32, #tpu.memory_space<vmem>>, vector<1x128xf32>
    tpu.vector_store %arg7[%c0_41, %c0_42], %73 {strides = array<i32>} : memref<1x128xf32, #tpu.memory_space<vmem>>, vector<1x128xf32>,
    %c1_i32 = arith.constant 1 : i32
    %75 = arith.cmpi eq, %arg0, %c1_i32 : i32
    %76 = arith.extui %75 : i1 to i32
    %c0_i32_43 = arith.constant 0 : i32
    %77 = arith.cmpi ne, %76, %c0_i32_43 : i32
    scf.if %77 {
      %c0_44 = arith.constant 0 : index
      %c0_45 = arith.constant 0 : index
      %78 = vector.load %arg6[%c0_44, %c0_45] : memref<1x128xf32, #tpu.memory_space<vmem>>, vector<1x128xf32>
      %cst_46 = arith.constant 0.001953125 : f32
      %79 = vector.broadcast %cst_46 : f32 to vector<1x128xf32>
      %80 = arith.mulf %78, %79 : vector<1x128xf32>
      %c0_47 = arith.constant 0 : index
      %c0_48 = arith.constant 0 : index
      %81 = vector.load %arg7[%c0_47, %c0_48] : memref<1x128xf32, #tpu.memory_space<vmem>>, vector<1x128xf32>
      %cst_49 = arith.constant 0.001953125 : f32
      %82 = vector.broadcast %cst_49 : f32 to vector<1x128xf32>
      %83 = arith.mulf %81, %82 : vector<1x128xf32>
      %84 = arith.mulf %80, %80 : vector<1x128xf32>
      %85 = arith.subf %83, %84 : vector<1x128xf32>
      %cst_50 = arith.constant 9.99999974E-6 : f32
      %86 = vector.broadcast %cst_50 : f32 to vector<1x128xf32>
      %87 = arith.addf %85, %86 : vector<1x128xf32>
      %88 = math.rsqrt %87 : vector<1x128xf32>
      %c0_51 = arith.constant 0 : index
      %c0_52 = arith.constant 0 : index
      %89 = vector.load %arg3[%c0_51, %c0_52] : memref<1x128xf32, #tpu.memory_space<vmem>>, vector<1x128xf32>
      %90 = arith.mulf %89, %88 : vector<1x128xf32>
      %c0_53 = arith.constant 0 : index
      %c0_54 = arith.constant 0 : index
      %91 = vector.load %arg4[%c0_53, %c0_54] : memref<1x128xf32, #tpu.memory_space<vmem>>, vector<1x128xf32>
      %92 = arith.mulf %80, %90 : vector<1x128xf32>
      %93 = arith.subf %91, %92 : vector<1x128xf32>
      %c0_55 = arith.constant 0 : index
      %c0_56 = arith.constant 0 : index
      %94 = vector.load %arg5[%c0_55, %c0_56] : memref<512x128xf32, #tpu.memory_space<vmem>>, vector<512x128xf32>
      %95 = vector.broadcast %90 : vector<1x128xf32> to vector<512x128xf32>
      %96 = arith.mulf %94, %95 : vector<512x128xf32>
      %97 = vector.broadcast %93 : vector<1x128xf32> to vector<512x128xf32>
      %98 = arith.addf %96, %97 : vector<512x128xf32>
      %c0_57 = arith.constant 0 : index
      %c0_58 = arith.constant 0 : index
      %99 = vector.load %arg5[%c0_57, %c0_58] : memref<512x128xf32, #tpu.memory_space<vmem>>, vector<512x128xf32>
      tpu.vector_store %arg5[%c0_57, %c0_58], %98 {strides = array<i32>} : memref<512x128xf32, #tpu.memory_space<vmem>>, vector<512x128xf32>,
    } else {
    }
    return
  }
  func.func @transform_0(%arg0: i32) -> (i32, i32, i32, i32) {
    %c0_i32 = arith.constant 0 : i32
    %c0_i32_0 = arith.constant 0 : i32
    %c0_i32_1 = arith.constant 0 : i32
    %c0_i32_2 = arith.constant 0 : i32
    return %arg0, %c0_i32, %c0_i32_0, %c0_i32_1 : i32, i32, i32, i32
  }
  func.func @transform_1(%arg0: i32) -> (i32, i32, i32) {
    %c0_i32 = arith.constant 0 : i32
    %c0_i32_0 = arith.constant 0 : i32
    %c0_i32_1 = arith.constant 0 : i32
    %c0_i32_2 = arith.constant 0 : i32
    return %c0_i32, %c0_i32_0, %c0_i32_1 : i32, i32, i32
  }
  func.func @transform_2(%arg0: i32) -> (i32, i32) {
    %c0_i32 = arith.constant 0 : i32
    %c0_i32_0 = arith.constant 0 : i32
    %c0_i32_1 = arith.constant 0 : i32
    return %c0_i32, %c0_i32_0 : i32, i32
  }
  func.func @transform_3(%arg0: i32) -> (i32, i32) {
    %c0_i32 = arith.constant 0 : i32
    %c0_i32_0 = arith.constant 0 : i32
    %c0_i32_1 = arith.constant 0 : i32
    return %c0_i32, %c0_i32_0 : i32, i32
  }
  func.func @transform_4(%arg0: i32) -> (i32, i32) {
    %c0_i32 = arith.constant 0 : i32
    %c0_i32_0 = arith.constant 0 : i32
    %c0_i32_1 = arith.constant 0 : i32
    return %c0_i32, %c0_i32_0 : i32, i32
  }
}

</mosaic_0001>

<bundles_post_ra>
// kernel: conv_bn_forward.1
= control target key start
LH: loop header
LB: loop body
LE: loop exit
PB: predicated region body
PF: predicated region fallthrough
CT: control target
= control target key end

     0   :  { %s4395_s15 = smov 0   ;;  %s5928_s0 = inlined_call_operand.vmem [shape: bf16[2,18,18,4], index: 0, kind: input, shape index: {}]   ;;  %s5929_s1 = inlined_call_operand.vmem [shape: bf16[9,4,128], index: 1, kind: input, shape index: {}]   ;;  %s5930_s2 = inlined_call_operand.vmem [shape: f32[1,128], index: 2, kind: input, shape index: {}]   ;;  %s5931_s3 = inlined_call_operand.vmem [shape: f32[1,128], index: 3, kind: input, shape index: {}]   ;;  %s5932_s4 = inlined_call_operand.vmem [shape: f32[512,128], index: 4, kind: output, shape index: {}]  }
   0x1 LB: > { %s4401_s16 = sadd.s32 4294967295, %s4367_s15   ;;  %p3369_p0 = scmp.ge.s32.totalorder %s4367_s15, 1  ;;  %s4367_s15 = sphi %s4395_s15, %s14_s15  }
   0x2   : > { %p157_p1 = scmp.lt.s32.totalorder %s4367_s15, 3 }
   0x4   : > { %p158_p2 = pnand %p3369_p0, %p157_p1 }
   0x6   : > { %161 = sbr.rel (%p158_p2) target bundleno = 649 (0x289), region = 36 }
   0xd   : > { %p178_p3 = scmp.lt.s32.totalorder %s4401_s16, 1  ;;  %p3371_p4 = scmp.ne.s32.totalorder %s4401_s16, 0 }
   0xe   : > { %v4369_v0 = vmov (!%p3371_p4), 0.0  }
   0xf   : > { %s179_s17 = scalar_select %p178_p3, %s4401_s16, 1 }
  0x10   : > { %187 = sbr.rel (%p3371_p4) target bundleno = 23 (0x17), region = 40  ;;  %188 = vst [vmem:[#allocation2] sm:$0x1] (!%p3371_p4), %v4369_v0  ;;  %189 = vst [vmem:[#allocation3] sm:$0x1] (!%p3371_p4), %v4369_v0 }
  0x11   : > { %s4327_s18 = smul.u32 216, %s179_s17 }
  0x13   : > { %s4410_s21 = scalar_lea.vmem %s5928_s0, %s4327_s18 }
  0x17 PF: > { %v3372_v1 = vld [vmem:[%s5929_s1 + $0x2] sm:$0x3]  ;;  %vm731_vm0 = vcmask 1041408   ;;  %v3504_v2 = vld [vmem:[%s5929_s1 + $0x8] sm:$0x3]  ;;  %vm682_vm3 = vcmask 31744  }
  0x18   : > { %4317 = vmatprep.subr.msk.bf16.mxu1 %vm731_vm0, %v3372_v1  ;;  %4321 = vmatprep.subr.msk.bf16.mxu0 %vm731_vm0, %v3504_v2  ;;  %v733_v3 = vsel %vm731_vm0, %v3372_v1, 0  ;;  %v4423_v4 = vsel %vm731_vm0, %v3504_v2, 0  ;;  %v4426_v5 = vld [vmem:[%s4410_s21] sm:$0xf]  ;;  %v4429_v6 = vld [vmem:[%s4410_s21 + $0x4] sm:$0xf] }
  0x19   : > { %5964 = vst [vmem:[#allocation4_spill] sm:$0xff] %v4423_v4  ;;  %3754 = vmatpush3.bf16.msra.mxu1 %v733_v3  ;;  %3890 = vmatpush3.bf16.msra.mxu0 %v4423_v4  ;;  %v192_v7 = vld [vmem:[%s4410_s21 + $0x8] sm:$0x1]  ;;  %vm245_vm1 = vsmask.f32 3328  ;;  %v249_v8 = vshrl.u32 %v4426_v5, 16 }
  0x1a   : > { %vm246_vm2 = vsmask.f32 7440  ;;  %v252_v9 = vshll.u32 %v4426_v5, 16  ;;  %v258_v10 = vshll.u32 %v4429_v6, 16  ;;  %v262_v11 = vshrl.u32 %v4429_v6, 16  ;;  %s3596_s18 = sshll.u32 %s4401_s16, 8 }
  0x1b   : > { %v244_v12 = vld [vmem:[%s5929_s1] sm:$0x3]  ;;  %v268_v13 = vshll.u32 %v192_v7, 16  ;;  %v4442_v14 = vld [vmem:[%s4410_s21 + $0xc] sm:$0xf]  ;;  %v251_v16 = vrot.slane %v249_v8, 4  ;;  %vm4464_vm4 = vmor %vm245_vm1, %vm246_vm2 }
  0x1c   : > { %4318 = vmatprep.subr.msk.bf16.mxu1 %vm731_vm0, %v244_v12  ;;  %v4445_v15 = vld [vmem:[%s4410_s21 + $0x10] sm:$0xf]  ;;  %v254_v17 = vrot.slane %v252_v9, 5  ;;  %v260_v18 = vrot.slane %v258_v10, 5  ;;  %v264_v19 = vrot.slane %v262_v11, 4  ;;  %v273_v22 = vshrl.u32 %v4442_v14, 16 }
  0x1d   : > { %v4448_v20 = vld [vmem:[%s4410_s21 + $0x14] sm:$0x1]  ;;  %v270_v21 = vrot.slane %v268_v13, 5  ;;  %v276_v23 = vshll.u32 %v4442_v14, 16  ;;  %v282_v24 = vshll.u32 %v4445_v15, 16  ;;  %v286_v28 = vshrl.u32 %v4445_v15, 16 }
  0x1e   : > { %v3523_v25 = vld [vmem:[%s5929_s1 + $0xa] sm:$0x3]  ;;  %v255_v26 = vor.u32 %v254_v17, %v251_v16  ;;  %v265_v27 = vor.u32 %v264_v19, %v260_v18  ;;  %v292_v29 = vshll.u32 %v4448_v20, 16  ;;  %v4460_v30 = vld [vmem:[%s4410_s21 + $0x18] sm:$0xf]  ;;  %v275_v32 = vrot.slane %v273_v22, 4 }
  0x1f   : > { %4323 = vmatprep.subr.msk.bf16.mxu0 %vm731_vm0, %v3523_v25  ;;  %v278_v33 = vrot.slane %v276_v23, 5  ;;  %v284_v34 = vrot.slane %v282_v24, 5  ;;  %v4470_v35 = vcombine.low %v4442_v14, %v4445_v15  ;;  %v288_v38 = vrot.slane %v286_v28, 4  ;;  %v4473_v40 = vld [vmem:[%s4410_s21 + $0x1c] sm:$0xf]  ;;  %p3597_p5 = scmp.ne.s32.totalorder %s4401_s16, 1 }
  0x20   : > { %v256_v36 = vrot.slane %v255_v26, 4  ;;  %v266_v37 = vrot.slane %v265_v27, 4  ;;  %v294_v39 = vrot.slane %v292_v29, 5  ;;  %v1219_v42 = vrot.slane %v4448_v20, 5  ;;  %v4478_v44 = vld [vmem:[%s4410_s21 + $0x20] sm:$0x1] }
  0x21   : > { %v279_v41 = vor.u32 %v278_v33, %v275_v32  ;;  %v1025_v43 = vsel %vm731_vm0, %v244_v12, 0  ;;  %v297_v45 = vshrl.u32 %v4460_v30, 16  ;;  %v289_v48 = vor.u32 %v288_v38, %v284_v34  ;;  %v4490_v58 = vld [vmem:[%s4410_s21 + $0x24] sm:$0xf]  ;;  %v4498_v63 = vld [vmem:[%s4410_s21 + $0x28] sm:$0xf] }
  0x22   : > { %v261_v46 = vsel %vm4464_vm4, %v256_v36, %v260_v18  ;;  %v271_v47 = vsel %vm4464_vm4, %v266_v37, %v270_v21  ;;  %v300_v49 = vshll.u32 %v4460_v30, 16  ;;  %v306_v53 = vshll.u32 %v4473_v40, 16  ;;  %v4503_v7 = vld [vmem:[%s4410_s21 + $0x2c] sm:$0x1]  ;;  %v4506_v8 = vld [vmem:[%s4410_s21 + $0x30] sm:$0xf] }
  0x23   : > { %v3373_v50 = vcombine.low %v261_v46, %v271_v47  ;;  %v280_v51 = vrot.slane %v279_v41, 4  ;;  %v299_v52 = vrot.slane %v297_v45, 4  ;;  %v290_v54 = vrot.slane %v289_v48, 4  ;;  %v4517_v23 = vld [vmem:[%s4410_s21 + $0x34] sm:$0xf] }
  0x24   : > { %v302_v55 = vrot.slane %v300_v49, 5  ;;  %v310_v56 = vshrl.u32 %v4473_v40, 16  ;;  %v316_v57 = vshll.u32 %v4478_v44, 16  ;;  %v308_v60 = vrot.slane %v306_v53, 5  ;;  %v4523_v29 = vld [vmem:[%s4410_s21 + $0x38] sm:$0x1] }
  0x25   : > { %3755 = vmatprep.mubr.msk.bf16.mxu1 %vm682_vm3, %v3373_v50  ;;  %v285_v59 = vsel %vm4464_vm4, %v280_v51, %v284_v34  ;;  %v1223_v61 = vrot.slane %v4473_v40, 5  ;;  %v1226_v62 = vrot.slane %v4478_v44, 5  ;;  %v295_v0 = vsel %vm4464_vm4, %v290_v54, %v294_v39  ;;  %v4527_v37 = vld [vmem:[%s4410_s21 + $0x3c] sm:$0xf]  ;;  %v4537_v49 = vld [vmem:[%s4410_s21 + $0x40] sm:$0xf] }
  0x26   : > { %v303_v1 = vor.u32 %v302_v55, %v299_v52  ;;  %v312_v2 = vrot.slane %v310_v56, 4  ;;  %v318_v3 = vrot.slane %v316_v57, 5  ;;  %v3374_v9 = vcombine.low %v285_v59, %v295_v0  ;;  %v4540_v53 = vld [vmem:[%s4410_s21 + $0x44] sm:$0x1]  ;;  %v4556_v0 = vld [vmem:[%s5929_s1 + $0xc] sm:$0x3] }
  0x27   : > { %v2064_v10 = vsel %vm731_vm0, %v3523_v25, 0  ;;  %v321_v11 = vshrl.u32 %v4490_v58, 16  ;;  %v324_v12 = vshll.u32 %v4490_v58, 16  ;;  %v330_v17 = vshll.u32 %v4498_v63, 16  ;;  %v4761_v4 = vld [vmem:[%s5929_s1 + $0xe] sm:$0x3] }
  0x28   : > { %v304_v13 = vrot.slane %v303_v1, 4  ;;  %v313_v16 = vor.u32 %v312_v2, %v308_v60  ;;  %v334_v18 = vshrl.u32 %v4498_v63, 16  ;;  %3891 = vmatprep.mubr.msk.bf16.mxu0 %vm682_vm3, %v3374_v9  ;;  %3756 = vmatmul.mubr.msk.bf16.vlgmr.msra.gmra.mrb[0].mxu1 %vm682_vm3, %v3374_v9  ;;  %v340_v22 = vshll.u32 %v4503_v7, 16  ;;  %5980 = vst [vmem:[#allocation16_spill] sm:$0xff] %v4761_v4 }
  0x29   : > { %v323_v19 = vrot.slane %v321_v11, 4  ;;  %v326_v21 = vrot.slane %v324_v12, 5  ;;  %v345_v24 = vshrl.u32 %v4506_v8, 16  ;;  %3788 = vmatpush3.bf16.msra.mxu1 %v1025_v43  ;;  %v332_v27 = vrot.slane %v330_v17, 5  ;;  %v4565_v17 = vld [vmem:[%s4410_s21 + $0x4c] sm:$0xf] }
  0x2a   : > { %v309_v25 = vsel %vm4464_vm4, %v304_v13, %v308_v60  ;;  %v314_v26 = vrot.slane %v313_v16, 4  ;;  %v336_v28 = vrot.slane %v334_v18, 4  ;;  %v342_v33 = vrot.slane %v340_v22, 5  ;;  %v4551_v60 = vld [vmem:[%s4410_s21 + $0x48] sm:$0xf] }
  0x2b   : > { %v327_v32 = vor.u32 %v326_v21, %v323_v19  ;;  %v347_v34 = vrot.slane %v345_v24, 4  ;;  %v348_v36 = vshll.u32 %v4506_v8, 16  ;;  %v354_v41 = vshll.u32 %v4517_v23, 16 }
  0x2c   : > { %v319_v38 = vsel %vm4464_vm4, %v314_v26, %v318_v3  ;;  %v337_v39 = vor.u32 %v336_v28, %v332_v27  ;;  %v358_v43 = vshrl.u32 %v4517_v23, 16  ;;  %v364_v48 = vshll.u32 %v4523_v29, 16  ;;  %v4578_v26 = vld [vmem:[%s4410_s21 + $0x50] sm:$0x1]  ;;  %v4582_v28 = vld [vmem:[%s4410_s21 + $0x54] sm:$0xf] }
  0x2d   : > { %v4533_v45 = vcombine.low %v309_v25, %v319_v38  ;;  %v328_v46 = vrot.slane %v327_v32, 4  ;;  %v350_v47 = vrot.slane %v348_v36, 5  ;;  %v356_v51 = vrot.slane %v354_v41, 5  ;;  %5969 = vst [vmem:[#allocation7_spill] sm:$0xff] %v4582_v28 }
  0x2e   : > { %v338_v50 = vrot.slane %v337_v39, 4  ;;  %v360_v52 = vrot.slane %v358_v43, 4  ;;  %v369_v54 = vshrl.u32 %v4527_v37, 16  ;;  %v366_v57 = vrot.slane %v364_v48, 5 }
  0x2f   : > { %5967 = vst [vmem:[#allocation5_spill] sm:$0xff] %v4533_v45  ;;  %3892 = vmatmul.mubr.msk.bf16.vlgmr.msra.gmra.mrb[0].mxu0 %vm682_vm3, %v4533_v45  ;;  %3759 = vmatprep.mubr.msk.bf16.mxu1 %vm682_vm3, %v4533_v45  ;;  %v333_v55 = vsel %vm4464_vm4, %v328_v46, %v332_v27  ;;  %v351_v56 = vor.u32 %v350_v47, %v347_v34  ;;  %v372_v59 = vshll.u32 %v4527_v37, 16  ;;  %v378_v9 = vshll.u32 %v4537_v49, 16  ;;  %v4590_v46 = vld [vmem:[%s4410_s21 + $0x58] sm:$0xf] }
  0x30   : > { %3924 = vmatpush3.bf16.msra.mxu0 %v2064_v10  ;;  %v343_v1 = vsel %vm4464_vm4, %v338_v50, %v342_v33  ;;  %v361_v2 = vor.u32 %v360_v52, %v356_v51  ;;  %v371_v3 = vrot.slane %v369_v54, 4  ;;  %v382_v16 = vshrl.u32 %v4537_v49, 16  ;;  %v4840_v45 = vld [vmem:[%s4410_s21 + $0xac] sm:$0xf] }
  0x31   : > { %v4561_v11 = vcombine.low %v333_v55, %v343_v1  ;;  %v352_v12 = vrot.slane %v351_v56, 4  ;;  %v374_v13 = vrot.slane %v372_v59, 5  ;;  %4324 = vmatprep.subr.msk.bf16.mxu0 %vm731_vm0, %v4556_v0  ;;  %v380_v18 = vrot.slane %v378_v9, 5  ;;  %v4602_v56 = vld [vmem:[%s4410_s21 + $0x5c] sm:$0x1] }
  0x32   : > { %v362_v10 = vrot.slane %v361_v2, 4  ;;  %v388_v19 = vshll.u32 %v4540_v53, 16  ;;  %v393_v21 = vshrl.u32 %v4551_v60, 16  ;;  %v384_v25 = vrot.slane %v382_v16, 4  ;;  %v4607_v9 = vld [vmem:[%s4410_s21 + $0x60] sm:$0xf] }
  0x33   : > { %5968 = vst [vmem:[#allocation6_spill] sm:$0xff] %v4561_v11  ;;  %3895 = vmatprep.mubr.msk.bf16.mxu0 %vm682_vm3, %v4561_v11  ;;  %3760 = vmatmul.mubr.msk.bf16.gmra.mrb[4].mxu1 %vm682_vm3, %v4561_v11  ;;  %v357_v22 = vsel %vm4464_vm4, %v352_v12, %v356_v51  ;;  %v375_v24 = vor.u32 %v374_v13, %v371_v3  ;;  %v396_v27 = vshll.u32 %v4551_v60, 16  ;;  %v402_v36 = vshll.u32 %v4565_v17, 16 }
  0x34   : > { %v367_v32 = vsel %vm4464_vm4, %v362_v10, %v366_v57  ;;  %v390_v33 = vrot.slane %v388_v19, 5  ;;  %v395_v34 = vrot.slane %v393_v21, 4  ;;  %v385_v41 = vor.u32 %v384_v25, %v380_v18 }
  0x35   : > { %v4587_v38 = vcombine.low %v357_v22, %v367_v32  ;;  %v376_v39 = vrot.slane %v375_v24, 4  ;;  %v398_v43 = vrot.slane %v396_v27, 5  ;;  %v404_v47 = vrot.slane %v402_v36, 5 }
  0x36   : > { %v406_v48 = vshrl.u32 %v4565_v17, 16  ;;  %v412_v50 = vshll.u32 %v4578_v26, 16  ;;  %v417_v51 = vshrl.u32 %v4582_v28, 16  ;;  %v386_v54 = vrot.slane %v385_v41, 4 }
  0x37   : > { %5970 = vst [vmem:[#allocation8_spill] sm:$0xff] %v4587_v38  ;;  %3896 = vmatmul.mubr.msk.bf16.gmra.mrb[4].mxu0 %vm682_vm3, %v4587_v38  ;;  %3763 = vmatprep.mubr.msk.bf16.mxu1 %vm682_vm3, %v4587_v38  ;;  %v381_v52 = vsel %vm4464_vm4, %v376_v39, %v380_v18  ;;  %v399_v55 = vor.u32 %v398_v43, %v395_v34  ;;  %v420_v57 = vshll.u32 %v4582_v28, 16  ;;  %v426_v3 = vshll.u32 %v4590_v46, 16  ;;  %v4613_v18 = vld [vmem:[%s4410_s21 + $0x64] sm:$0xf] }
  0x38   : > { %v408_v59 = vrot.slane %v406_v48, 4  ;;  %v414_v1 = vrot.slane %v412_v50, 5  ;;  %v419_v2 = vrot.slane %v417_v51, 4  ;;  %v391_v12 = vsel %vm4464_vm4, %v386_v54, %v390_v33  ;;  %v4621_v34 = vld [vmem:[%s4410_s21 + $0x68] sm:$0x1] }
  0x39   : > { %v400_v13 = vrot.slane %v399_v55, 4  ;;  %v422_v16 = vrot.slane %v420_v57, 5  ;;  %v430_v10 = vshrl.u32 %v4590_v46, 16  ;;  %v4615_v19 = vcombine.low %v381_v52, %v391_v12 }
  0x3a   : > { %v409_v21 = vor.u32 %v408_v59, %v404_v47  ;;  %v428_v22 = vrot.slane %v426_v3, 5  ;;  %v436_v24 = vshll.u32 %v4602_v56, 16  ;;  %v441_v33 = vshrl.u32 %v4607_v9, 16  ;;  %v4637_v59 = vld [vmem:[%s5929_s1 + $0x4] sm:$0x3] }
  0x3b   : > { %5971 = vst [vmem:[#allocation9_spill] sm:$0xff] %v4615_v19  ;;  %v405_v25 = vsel %vm4464_vm4, %v400_v13, %v404_v47  ;;  %v423_v27 = vor.u32 %v422_v16, %v419_v2  ;;  %v432_v32 = vrot.slane %v430_v10, 4  ;;  %3899 = vmatprep.mubr.msk.bf16.mxu0 %vm682_vm3, %v4615_v19  ;;  %3764 = vmatmul.mubr.msk.bf16.gmra.mrb[8].mxu1 %vm682_vm3, %v4615_v19  ;;  %v444_v41 = vshll.u32 %v4607_v9, 16  ;;  %v4644_v16 = vld [vmem:[%s4410_s21 + $0x6c] sm:$0xf] }
  0x3c   : > { %v410_v36 = vrot.slane %v409_v21, 4  ;;  %v438_v39 = vrot.slane %v436_v24, 5  ;;  %v450_v43 = vshll.u32 %v4613_v18, 16  ;;  %v443_v50 = vrot.slane %v441_v33, 4  ;;  %4319 = vmatprep.subr.msk.bf16.mxu1 %vm731_vm0, %v4637_v59  ;;  %v4649_v21 = vld [vmem:[%s4410_s21 + $0x70] sm:$0xf] }
  0x3d   : > { %v424_v47 = vrot.slane %v423_v27, 4  ;;  %v433_v48 = vor.u32 %v432_v32, %v428_v22  ;;  %v454_v51 = vshrl.u32 %v4613_v18, 16  ;;  %v446_v54 = vrot.slane %v444_v41, 5  ;;  %v4666_v41 = vld [vmem:[%s4410_s21 + $0x74] sm:$0x1] }
  0x3e   : > { %v415_v52 = vsel %vm4464_vm4, %v410_v36, %v414_v1  ;;  %v452_v55 = vrot.slane %v450_v43, 5  ;;  %v460_v57 = vshll.u32 %v4621_v34, 16  ;;  %vm1204_vm5 = vcmask 1042432  }
  0x3f   : > { %v4639_v2 = vcombine.low %v405_v25, %v415_v52  ;;  %v429_v3 = vsel %vm4464_vm4, %v424_v47, %v428_v22  ;;  %v434_v12 = vrot.slane %v433_v48, 4  ;;  %v456_v13 = vrot.slane %v454_v51, 4 }
  0x40   : > { %v447_v1 = vor.u32 %v446_v54, %v443_v50  ;;  %v462_v10 = vrot.slane %v460_v57, 5  ;;  %vm1205_vm6 = vcmask 1046532   ;;  %v3438_v27 = vrot.slane %v4442_v14, 9 }
  0x41   : > { %5972 = vst [vmem:[#allocation10_spill] sm:$0xff] %v4639_v2  ;;  %3900 = vmatmul.mubr.msk.bf16.gmra.mrb[8].mxu0 %vm682_vm3, %v4639_v2  ;;  %3767 = vmatprep.mubr.msk.bf16.mxu1 %vm682_vm3, %v4639_v2  ;;  %v439_v22 = vsel %vm4464_vm4, %v434_v12, %v438_v39  ;;  %v457_v24 = vor.u32 %v456_v13, %v452_v55  ;;  %vm4657_vm7 = vmor %vm1204_vm5, %vm1205_vm6  ;;  %v1216_v32 = vrot.slane %v4445_v15, 5  ;;  %v465_v43 = vshrl.u32 %v4644_v16, 16 }
  0x42   : > { %v4663_v33 = vcombine.low %v429_v3, %v439_v22  ;;  %v448_v36 = vrot.slane %v447_v1, 4  ;;  %v468_v47 = vshll.u32 %v4644_v16, 16  ;;  %v474_v51 = vshll.u32 %v4649_v21, 16  ;;  %v4688_v1 = vld [vmem:[%s4410_s21 + $0x78] sm:$0xf] }
  0x43   : > { %v458_v39 = vrot.slane %v457_v24, 4  ;;  %v1217_v48 = vsel %vm4657_vm7, %v3438_v27, %v1216_v32  ;;  %v1218_v50 = vrot.slane %v1216_v32, 4  ;;  %v467_v15 = vrot.slane %v465_v43, 4  ;;  %v4695_v32 = vld [vmem:[%s4410_s21 + $0x7c] sm:$0xf] }
  0x44   : > { %5975 = vst [vmem:[#allocation11_spill] sm:$0xff] %v4663_v33  ;;  %3903 = vmatprep.mubr.msk.bf16.mxu0 %vm682_vm3, %v4663_v33  ;;  %3768 = vmatmul.mubr.msk.bf16.gmra.mrb[12].mxu1 %vm682_vm3, %v4663_v33  ;;  %v453_v14 = vsel %vm4464_vm4, %v448_v36, %v452_v55  ;;  %v470_v52 = vrot.slane %v468_v47, 5  ;;  %v478_v54 = vshrl.u32 %v4649_v21, 16  ;;  %v476_v12 = vrot.slane %v474_v51, 5 }
  0x45   : > { %v463_v57 = vsel %vm4464_vm4, %v458_v39, %v462_v10  ;;  %v1220_v3 = vsel %vm4657_vm7, %v1218_v50, %v1219_v42  ;;  %v484_v13 = vshll.u32 %v4666_v41, 16  ;;  %v3439_v20 = vrot.slane %v4460_v30, 9  ;;  %v4705_v39 = vld [vmem:[%s4410_s21 + $0x80] sm:$0x1] }
  0x46   : > { %v4690_v22 = vcombine.low %v453_v14, %v463_v57  ;;  %v4692_v55 = vcombine.low %v1217_v48, %v1220_v3  ;;  %v471_v24 = vor.u32 %v470_v52, %v467_v15  ;;  %v480_v27 = vrot.slane %v478_v54, 4 }
  0x47   : > { %v486_v10 = vrot.slane %v484_v13, 5  ;;  %v1225_v42 = vrot.slane %v1223_v61, 4  ;;  %v2270_v36 = vsel %vm731_vm0, %v4556_v0, 0  ;;  %v489_v48 = vshrl.u32 %v4688_v1, 16 }
  0x48   : > { %5976 = vst [vmem:[#allocation12_spill] sm:$0xff] %v4690_v22  ;;  %5977 = vst [vmem:[#allocation13_spill] sm:$0xff] %v4692_v55  ;;  %3771 = vmatprep.mubr.msk.bf16.mxu1 %vm682_vm3, %v4690_v22  ;;  %v472_v43 = vrot.slane %v471_v24, 4  ;;  %v481_v47 = vor.u32 %v480_v27, %v476_v12  ;;  %v492_v50 = vshll.u32 %v4688_v1, 16  ;;  %v1224_v0 = vsel %vm4657_vm7, %v3439_v20, %v1223_v61  ;;  %v4729_v24 = vld [vmem:[%s4410_s21 + $0x84] sm:$0xf] }
  0x49   : > { %3904 = vmatmul.mubr.msk.bf16.gmra.mrb[12].mxu0 %vm682_vm3, %v4690_v22  ;;  %v1227_v51 = vsel %vm4657_vm7, %v1225_v42, %v1226_v62  ;;  %v498_v14 = vshll.u32 %v4695_v32, 16  ;;  %v502_v15 = vshrl.u32 %v4695_v32, 16  ;;  %v491_v61 = vrot.slane %v489_v48, 4 }
  0x4a   : > { %3925 = vmatprep.mubr.msk.bf16.mxu0 %vm682_vm3, %v4692_v55  ;;  %v477_v52 = vsel %vm4464_vm4, %v472_v43, %v476_v12  ;;  %v482_v54 = vrot.slane %v481_v47, 4  ;;  %v4725_v57 = vcombine.low %v1224_v0, %v1227_v51  ;;  %v494_v44 = vrot.slane %v492_v50, 5  ;;  %v4737_v43 = vld [vmem:[%s4410_s21 + $0x88] sm:$0xf]  ;;  %v4742_v51 = vld [vmem:[%s4410_s21 + $0x8c] sm:$0x1] }
  0x4b   : > { %v500_v3 = vrot.slane %v498_v14, 5  ;;  %v504_v13 = vrot.slane %v502_v15, 4  ;;  %v508_v62 = vshll.u32 %v4705_v39, 16  ;;  %v3440_v20 = vrot.slane %v4490_v58, 9  ;;  %v4867_v55 = vld [vmem:[%s4410_s21 + $0xb4] sm:$0xf] }
  0x4c   : > { %5978 = vst [vmem:[#allocation14_spill] sm:$0xff] %v4725_v57  ;;  %v487_v27 = vsel %vm4464_vm4, %v482_v54, %v486_v10  ;;  %v1230_v42 = vrot.slane %v4498_v63, 5  ;;  %v1233_v12 = vrot.slane %v4503_v7, 5  ;;  %v495_v48 = vor.u32 %v494_v44, %v491_v61 }
  0x4d   : > { %v4739_v47 = vcombine.low %v477_v52, %v487_v27  ;;  %v505_v50 = vor.u32 %v504_v13, %v500_v3  ;;  %v510_v0 = vrot.slane %v508_v62, 5  ;;  %v513_v15 = vshrl.u32 %v4729_v24, 16  ;;  %v4753_v13 = vld [vmem:[%s4410_s21 + $0x90] sm:$0xf] }
  0x4e   : > { %v1231_v14 = vsel %vm4657_vm7, %v3440_v20, %v1230_v42  ;;  %v1232_v10 = vrot.slane %v1230_v42, 4  ;;  %v516_v54 = vshll.u32 %v4729_v24, 16  ;;  %v496_v7 = vrot.slane %v495_v48, 4 }
  0x4f   : > { %5979 = vst [vmem:[#allocation15_spill] sm:$0xff] %v4739_v47  ;;  %3772 = vmatmul.mubr.msk.bf16.gmra.mrb[16].mxu1 %vm682_vm3, %v4739_v47  ;;  %v506_v52 = vrot.slane %v505_v50, 4  ;;  %v522_v61 = vshll.u32 %v4737_v43, 16  ;;  %v526_v44 = vshrl.u32 %v4737_v43, 16  ;;  %v515_v27 = vrot.slane %v513_v15, 4 }
  0x50   : > { %v1234_v62 = vsel %vm4657_vm7, %v1232_v10, %v1233_v12  ;;  %v518_v20 = vrot.slane %v516_v54, 5  ;;  %v532_v42 = vshll.u32 %v4742_v51, 16  ;;  %v501_v48 = vsel %vm4464_vm4, %v496_v7, %v500_v3  ;;  %v4772_v10 = vld [vmem:[%s4410_s21 + $0x94] sm:$0xf] }
  0x51   : > { %3926 = vmatmul.mubr.msk.bf16.vlgmr.msra.gmra.mrb[0].mxu0 %vm682_vm3, %v4725_v57  ;;  %v511_v50 = vsel %vm4464_vm4, %v506_v52, %v510_v0  ;;  %v4769_v47 = vcombine.low %v1231_v14, %v1234_v62  ;;  %v524_v12 = vrot.slane %v522_v61, 5  ;;  %v528_v22 = vrot.slane %v526_v44, 4  ;;  %v4787_v61 = vld [vmem:[%s4410_s21 + $0x98] sm:$0x1] }
  0x52   : > { %3958 = vmatpush3.bf16.msra.mxu0 %v2270_v36  ;;  %v4774_v15 = vcombine.low %v501_v48, %v511_v50  ;;  %v519_v54 = vor.u32 %v518_v20, %v515_v27  ;;  %v534_v33 = vrot.slane %v532_v42, 5  ;;  %v3441_v3 = vrot.slane %v4506_v8, 9 }
  0x53   : > { %5981 = vst [vmem:[#allocation17_spill] sm:$0xff] %v4769_v47  ;;  %3929 = vmatprep.mubr.msk.bf16.mxu0 %vm682_vm3, %v4769_v47  ;;  %v1237_v7 = vrot.slane %v4517_v23, 5  ;;  %v1240_v0 = vrot.slane %v4523_v29, 5  ;;  %v537_v14 = vshrl.u32 %v4753_v13, 16  ;;  %4325 = vmatprep.subr.msk.bf16.mxu0 %vm731_vm0, %v4761_v4  ;;  %v529_v52 = vor.u32 %v528_v22, %v524_v12 }
  0x54   : > { %5982 = vst [vmem:[#allocation18_spill] sm:$0xff] %v4774_v15  ;;  %3775 = vmatprep.mubr.msk.bf16.mxu1 %vm682_vm3, %v4774_v15  ;;  %v520_v36 = vrot.slane %v519_v54, 4  ;;  %v540_v44 = vshll.u32 %v4753_v13, 16  ;;  %v546_v62 = vshll.u32 %v4772_v10, 16  ;;  %v550_v42 = vshrl.u32 %v4772_v10, 16 }
  0x55   : > { %v1238_v29 = vsel %vm4657_vm7, %v3441_v3, %v1237_v7  ;;  %v1239_v27 = vrot.slane %v1237_v7, 4  ;;  %v539_v20 = vrot.slane %v537_v14, 4  ;;  %v530_v50 = vrot.slane %v529_v52, 4  ;;  %v4801_v7 = vld [vmem:[%s4410_s21 + $0x9c] sm:$0xf] }
  0x56   : > { %v525_v48 = vsel %vm4464_vm4, %v520_v36, %v524_v12  ;;  %v542_v22 = vrot.slane %v540_v44, 5  ;;  %v548_v54 = vrot.slane %v546_v62, 5  ;;  %v552_v2 = vrot.slane %v550_v42, 4  ;;  %v4809_v52 = vld [vmem:[%s4410_s21 + $0xa0] sm:$0xf] }
  0x57   : > { %v1241_v15 = vsel %vm4657_vm7, %v1239_v27, %v1240_v0  ;;  %v556_v19 = vshll.u32 %v4787_v61, 16  ;;  %v3442_v3 = vrot.slane %v4527_v37, 9  ;;  %v535_v14 = vsel %vm4464_vm4, %v530_v50, %v534_v33  ;;  %v4815_v42 = vld [vmem:[%s4410_s21 + $0xa4] sm:$0x1] }
  0x58   : > { %v4805_v38 = vcombine.low %v1238_v29, %v1241_v15  ;;  %v543_v12 = vor.u32 %v542_v22, %v539_v20  ;;  %v1244_v36 = vrot.slane %v4537_v49, 5  ;;  %v4811_v44 = vcombine.low %v525_v48, %v535_v14 }
  0x59   : > { %v553_v0 = vor.u32 %v552_v2, %v548_v54  ;;  %v558_v62 = vrot.slane %v556_v19, 5  ;;  %v1247_v27 = vrot.slane %v4540_v53, 5  ;;  %v561_v20 = vshrl.u32 %v4801_v7, 16 }
  0x5a   : > { %5983 = vst [vmem:[#allocation19_spill] sm:$0xff] %v4805_v38  ;;  %5984 = vst [vmem:[#allocation20_spill] sm:$0xff] %v4811_v44  ;;  %3930 = vmatmul.mubr.msk.bf16.gmra.mrb[4].mxu0 %vm682_vm3, %v4805_v38  ;;  %v544_v33 = vrot.slane %v543_v12, 4  ;;  %v1245_v15 = vsel %vm4657_vm7, %v3442_v3, %v1244_v36  ;;  %v1246_v29 = vrot.slane %v1244_v36, 4  ;;  %3776 = vmatmul.mubr.msk.bf16.gmra.mrb[20].mxu1 %vm682_vm3, %v4811_v44  ;;  %v564_v53 = vshll.u32 %v4801_v7, 16 }
  0x5b   : > { %v554_v19 = vrot.slane %v553_v0, 4  ;;  %v570_v2 = vshll.u32 %v4809_v52, 16  ;;  %v574_v48 = vshrl.u32 %v4809_v52, 16  ;;  %v563_v3 = vrot.slane %v561_v20, 4  ;;  %v4833_v12 = vld [vmem:[%s4410_s21 + $0xa8] sm:$0xf] }
  0x5c   : > { %v549_v50 = vsel %vm4464_vm4, %v544_v33, %v548_v54  ;;  %v1248_v22 = vsel %vm4657_vm7, %v1246_v29, %v1247_v27  ;;  %v580_v14 = vshll.u32 %v4815_v42, 16  ;;  %v566_v44 = vrot.slane %v564_v53, 5  ;;  %v4853_v53 = vld [vmem:[%s4410_s21 + $0xb0] sm:$0x1] }
  0x5d   : > { %v559_v36 = vsel %vm4464_vm4, %v554_v19, %v558_v62  ;;  %v4837_v0 = vcombine.low %v1245_v15, %v1248_v22  ;;  %v572_v11 = vrot.slane %v570_v2, 5  ;;  %v576_v54 = vrot.slane %v574_v48, 4 }
  0x5e   : > { %v4842_v38 = vcombine.low %v549_v50, %v559_v36  ;;  %v582_v33 = vrot.slane %v580_v14, 5  ;;  %v3443_v27 = vrot.slane %v4551_v60, 9  ;;  %v567_v29 = vor.u32 %v566_v44, %v563_v3 }
  0x5f   : > { %5985 = vst [vmem:[#allocation21_spill] sm:$0xff] %v4837_v0  ;;  %3933 = vmatprep.mubr.msk.bf16.mxu0 %vm682_vm3, %v4837_v0  ;;  %v1251_v20 = vrot.slane %v4565_v17, 5  ;;  %v1254_v62 = vrot.slane %v4578_v26, 5  ;;  %v585_v15 = vshrl.u32 %v4833_v12, 16  ;;  %v577_v19 = vor.u32 %v576_v54, %v572_v11 }
  0x60   : > { %5986 = vst [vmem:[#allocation22_spill] sm:$0xff] %v4842_v38  ;;  %3779 = vmatprep.mubr.msk.bf16.mxu1 %vm682_vm3, %v4842_v38  ;;  %v588_v2 = vshll.u32 %v4833_v12, 16  ;;  %v594_v48 = vshll.u32 %v4840_v45, 16  ;;  %v598_v50 = vshrl.u32 %v4840_v45, 16  ;;  %v568_v44 = vrot.slane %v567_v29, 4 }
  0x61   : > { %v1252_v22 = vsel %vm4657_vm7, %v3443_v27, %v1251_v20  ;;  %v1253_v26 = vrot.slane %v1251_v20, 4  ;;  %v587_v3 = vrot.slane %v585_v15, 4  ;;  %v578_v14 = vrot.slane %v577_v19, 4 }
  0x62   : > { %v590_v36 = vrot.slane %v588_v2, 5  ;;  %v596_v38 = vrot.slane %v594_v48, 5  ;;  %v600_v54 = vrot.slane %v598_v50, 4  ;;  %v573_v0 = vsel %vm4464_vm4, %v568_v44, %v572_v11  ;;  %v4874_v2 = vld [vmem:[%s4410_s21 + $0xb8] sm:$0xf] }
  0x63   : > { %v1255_v47 = vsel %vm4657_vm7, %v1253_v26, %v1254_v62  ;;  %v604_v57 = vshll.u32 %v4853_v53, 16  ;;  %v3444_v29 = vrot.slane %v4582_v28, 9  ;;  %v583_v27 = vsel %vm4464_vm4, %v578_v14, %v582_v33 }
  0x64   : > { %v4871_v20 = vcombine.low %v1252_v22, %v1255_v47  ;;  %v591_v15 = vor.u32 %v590_v36, %v587_v3  ;;  %v601_v19 = vor.u32 %v600_v54, %v596_v38  ;;  %v4876_v11 = vcombine.low %v573_v0, %v583_v27  ;;  %v4889_v22 = vld [vmem:[%s4410_s21 + $0xbc] sm:$0x1] }
  0x65   : > { %v606_v48 = vrot.slane %v604_v57, 5  ;;  %v1258_v62 = vrot.slane %v4590_v46, 5  ;;  %v1261_v50 = vrot.slane %v4602_v56, 5  ;;  %v609_v47 = vshrl.u32 %v4867_v55, 16 }
  0x66   : > { %5987 = vst [vmem:[#allocation23_spill] sm:$0xff] %v4871_v20  ;;  %5988 = vst [vmem:[#allocation24_spill] sm:$0xff] %v4876_v11  ;;  %3934 = vmatmul.mubr.msk.bf16.gmra.mrb[8].mxu0 %vm682_vm3, %v4871_v20  ;;  %v592_v44 = vrot.slane %v591_v15, 4  ;;  %v602_v26 = vrot.slane %v601_v19, 4  ;;  %v612_v33 = vshll.u32 %v4867_v55, 16  ;;  %3780 = vmatmul.mubr.msk.bf16.gmra.mrb[24].mxu1 %vm682_vm3, %v4876_v11  ;;  %v618_v56 = vshll.u32 %v4874_v2, 16 }
  0x67   : > { %v1259_v0 = vsel %vm4657_vm7, %v3444_v29, %v1258_v62  ;;  %v1260_v57 = vrot.slane %v1258_v62, 4  ;;  %v622_v3 = vshrl.u32 %v4874_v2, 16  ;;  %v611_v54 = vrot.slane %v609_v47, 4 }
  0x68   : > { %v597_v14 = vsel %vm4464_vm4, %v592_v44, %v596_v38  ;;  %v607_v36 = vsel %vm4464_vm4, %v602_v26, %v606_v48  ;;  %v614_v27 = vrot.slane %v612_v33, 5  ;;  %v620_v19 = vrot.slane %v618_v56, 5 }
  0x69   : > { %v4897_v15 = vcombine.low %v597_v14, %v607_v36  ;;  %v1262_v29 = vsel %vm4657_vm7, %v1260_v57, %v1261_v50  ;;  %v624_v62 = vrot.slane %v622_v3, 4  ;;  %v628_v4 = vshll.u32 %v4889_v22, 16 }
  0x6a   : > { %v4901_v11 = vcombine.low %v1259_v0, %v1262_v29  ;;  %v615_v20 = vor.u32 %v614_v27, %v611_v54  ;;  %v3445_v28 = vrot.slane %v4607_v9, 9  ;;  %v1265_v48 = vrot.slane %v4613_v18, 5 }
  0x6b   : > { %3783 = vmatprep.mubr.msk.bf16.mxu1 %vm682_vm3, %v4897_v15  ;;  %v625_v38 = vor.u32 %v624_v62, %v620_v19  ;;  %v1268_v44 = vrot.slane %v4621_v34, 5  ;;  %v3446_v26 = vrot.slane %v4644_v16, 9  ;;  %v630_v47 = vrot.slane %v628_v4, 5 }
  0x6c   : > { %3937 = vmatprep.mubr.msk.bf16.mxu0 %vm682_vm3, %v4901_v11  ;;  %v616_v50 = vrot.slane %v615_v20, 4  ;;  %v1272_v33 = vrot.slane %v4649_v21, 5  ;;  %v1275_v0 = vrot.slane %v4666_v41, 5  ;;  %v1266_v56 = vsel %vm4657_vm7, %v3445_v28, %v1265_v48 }
  0x6d   : > { %v626_v57 = vrot.slane %v625_v38, 4  ;;  %v1267_v3 = vrot.slane %v1265_v48, 4  ;;  %v3405_v14 = vcombine.low %v4426_v5, %v4429_v6  ;;  %v3447_v4 = vrot.slane %v4688_v1, 9 }
  0x6e   : > { %v621_v34 = vsel %vm4464_vm4, %v616_v50, %v620_v19  ;;  %v1273_v36 = vsel %vm4657_vm7, %v3446_v26, %v1272_v33  ;;  %v1274_v20 = vrot.slane %v1272_v33, 4  ;;  %v1279_v28 = vrot.slane %v4695_v32, 5 }
  0x6f   : > { %v631_v41 = vsel %vm4464_vm4, %v626_v57, %v630_v47  ;;  %v1269_v54 = vsel %vm4657_vm7, %v1267_v3, %v1268_v44  ;;  %v1282_v27 = vrot.slane %v4705_v39, 5  ;;  %v3448_v38 = vrot.slane %v4729_v24, 9 }
  0x70   : > { %v4929_v5 = vcombine.low %v621_v34, %v631_v41  ;;  %v4931_v6 = vcombine.low %v1266_v56, %v1269_v54  ;;  %v1276_v29 = vsel %vm4657_vm7, %v1274_v20, %v1275_v0  ;;  %v1281_v62 = vrot.slane %v1279_v28, 4  ;;  %v4974_v54 = vld [vmem:[%s5929_s1 + $0x6] sm:$0x3] }
  0x71   : > { %v4935_v19 = vcombine.low %v1273_v36, %v1276_v29  ;;  %v1286_v39 = vrot.slane %v4737_v43, 5  ;;  %v1289_v48 = vrot.slane %v4742_v51, 5  ;;  %v1280_v44 = vsel %vm4657_vm7, %v3447_v4, %v1279_v28 }
  0x72   : > { %3784 = vmatmul.mubr.msk.bf16.gmra.mrb[28].mxu1 %vm682_vm3, %v4929_v5  ;;  %3938 = vmatmul.mubr.msk.bf16.gmra.mrb[12].mxu0 %vm682_vm3, %v4931_v6  ;;  %v1283_v26 = vsel %vm4657_vm7, %v1281_v62, %v1282_v27  ;;  %v1293_v50 = vrot.slane %v4772_v10, 5  ;;  %v1300_v0 = vrot.slane %v4809_v52, 5  ;;  %v1418_v51 = vsel %vm731_vm0, %v4637_v59, 0 }
  0x73   : > { %3789 = vmatprep.mubr.msk.bf16.mxu1 %vm682_vm3, %v3405_v14  ;;  %3941 = vmatprep.mubr.msk.bf16.mxu0 %vm682_vm3, %v4935_v19  ;;  %v1288_v47 = vrot.slane %v1286_v39, 4  ;;  %v1287_v33 = vsel %vm4657_vm7, %v3448_v38, %v1286_v39  ;;  %v4957_v57 = vcombine.low %v1280_v44, %v1283_v26  ;;  %v4963_v3 = vcombine.low %v4460_v30, %v4473_v40 }
  0x74   : > { %v3449_v14 = vrot.slane %v4753_v13, 9  ;;  %v1295_v34 = vrot.slane %v1293_v50, 4  ;;  %v1296_v36 = vrot.slane %v4787_v61, 5  ;;  %v3450_v4 = vrot.slane %v4801_v7, 9 }
  0x75   : > { %v1290_v56 = vsel %vm4657_vm7, %v1288_v47, %v1289_v48  ;;  %v1302_v41 = vrot.slane %v1300_v0, 4  ;;  %v1303_v59 = vrot.slane %v4815_v42, 5  ;;  %v1307_v30 = vrot.slane %v4840_v45, 5 }
  0x76   : > { %v4967_v20 = vcombine.low %v1287_v33, %v1290_v56  ;;  %v4985_v40 = vcombine.low %v4490_v58, %v4498_v63  ;;  %v1294_v61 = vsel %vm4657_vm7, %v3449_v14, %v1293_v50  ;;  %v1297_v42 = vsel %vm4657_vm7, %v1295_v34, %v1296_v36 }
  0x77   : > { %v1301_v28 = vsel %vm4657_vm7, %v3450_v4, %v1300_v0  ;;  %v1304_v27 = vsel %vm4657_vm7, %v1302_v41, %v1303_v59  ;;  %v1314_v29 = vrot.slane %v4874_v2, 5  ;;  %v5000_v58 = vcombine.low %v4644_v16, %v4649_v21 }
  0x78   : > { %v5006_v63 = vcombine.low %v4506_v8, %v4517_v23  ;;  %v3451_v62 = vrot.slane %v4833_v12, 9  ;;  %v5011_v38 = vcombine.low %v4688_v1, %v4695_v32  ;;  %v5015_v39 = vcombine.low %v4729_v24, %v4737_v43 }
  0x79   : > { %v5017_v16 = vcombine.low %v1294_v61, %v1297_v42  ;;  %v1309_v21 = vrot.slane %v1307_v30, 4  ;;  %v1310_v48 = vrot.slane %v4853_v53, 5  ;;  %v5022_v44 = vcombine.low %v4753_v13, %v4772_v10  ;;  %v5041_v10 = vld [vmem:[%s4410_s21 + $0xc4] sm:$0xf]  ;;  %v5061_v53 = vld [vmem:[%s4410_s21 + $0xc0] sm:$0xf] }
  0x7a   : > { %3790 = vmatmul.mubr.msk.bf16.vlgmr.msra.gmra.mrb[0].mxu1 %vm682_vm3, %v4470_v35  ;;  %3942 = vmatmul.mubr.msk.bf16.gmra.mrb[16].mxu0 %vm682_vm3, %v4957_v57  ;;  %v5024_v8 = vcombine.low %v1301_v28, %v1304_v27  ;;  %v5028_v23 = vcombine.low %v4801_v7, %v4809_v52  ;;  %v5032_v1 = vcombine.low %v4833_v12, %v4840_v45  ;;  %v3452_v24 = vrot.slane %v4867_v55, 9 }
  0x7b   : > { %3822 = vmatpush3.bf16.msra.mxu1 %v1418_v51  ;;  %3793 = vmatprep.mubr.msk.bf16.mxu1 %vm682_vm3, %v4963_v3  ;;  %v5036_v32 = vcombine.low %v4867_v55, %v4874_v2  ;;  %v1316_v43 = vrot.slane %v1314_v29, 4  ;;  %v1317_v13 = vrot.slane %v4889_v22, 5  ;;  %v1308_v45 = vsel %vm4657_vm7, %v3451_v62, %v1307_v30  ;;  %v240_v2 = vld [vmem:[%s4410_s21 + $0xc8] sm:$0x1] }
  0x7c   : > { %3945 = vmatprep.mubr.msk.bf16.mxu0 %vm682_vm3, %v4967_v20  ;;  %4320 = vmatprep.subr.msk.bf16.mxu1 %vm731_vm0, %v4974_v54  ;;  %v1311_v7 = vsel %vm4657_vm7, %v1309_v21, %v1310_v48  ;;  %v2050_v55 = vrot.slane %v5041_v10, 5  ;;  %v1315_v52 = vsel %vm4657_vm7, %v3452_v24, %v1314_v29  ;;  %v5066_v22 = vcombine.low %v4527_v37, %v4537_v49  ;;  %v5989_v29 = vld [vmem:[#allocation7_spill] sm:$0xff] }
  0x7d   : > { %v1318_v12 = vsel %vm4657_vm7, %v1316_v43, %v1317_v13  ;;  %v5068_v26 = vcombine.low %v1308_v45, %v1311_v7  ;;  %v5072_v50 = vcombine.low %v4551_v60, %v4565_v17  ;;  %v1820_v47 = vshrl.u32 %v5061_v53, 16  ;;  %v4355_v45 = vld [vmem:[%s4410_s21 + $0x4] sm:$0xf] }
  0x7e   : > { %v1823_v33 = vshll.u32 %v5061_v53, 16  ;;  %v1829_v0 = vshll.u32 %v5041_v10, 16  ;;  %v1833_v51 = vshrl.u32 %v5041_v10, 16  ;;  %v5078_v56 = vcombine.low %v1315_v52, %v1318_v12  ;;  %v4357_v12 = vld [vmem:[%s4410_s21] sm:$0xf] }
  0x7f   : > { %v3522_v14 = vrot.slane %v5061_v53, 9  ;;  %v2052_v37 = vrot.slane %v2050_v55, 4  ;;  %v2053_v49 = vrot.slane %v240_v2, 5  ;;  %v1822_v34 = vrot.slane %v1820_v47, 4 }
  0x80   : > { %v1825_v36 = vrot.slane %v1823_v33, 5  ;;  %v1831_v4 = vrot.slane %v1829_v0, 5  ;;  %v1835_v41 = vrot.slane %v1833_v51, 4  ;;  %v1839_v59 = vshll.u32 %v240_v2, 16 }
  0x81   : > { %v2051_v30 = vsel %vm4657_vm7, %v3522_v14, %v2050_v55  ;;  %v2054_v61 = vsel %vm4657_vm7, %v2052_v37, %v2053_v49  ;;  %v5095_v62 = vcombine.low %v5989_v29, %v4590_v46  ;;  %v5105_v43 = vcombine.low %v4607_v9, %v4613_v18  ;;  %v5990_v46 = vld [vmem:[#allocation16_spill] sm:$0xff]  ;;  %v3578_v18 = vld [vmem:[%s5929_s1 + $0x10] sm:$0x3]  ;;  %v5992_v49 = vld [vmem:[#allocation14_spill] sm:$0xff] }
  0x82   : > { %3794 = vmatmul.mubr.msk.bf16.gmra.mrb[4].mxu1 %vm682_vm3, %v4985_v40  ;;  %3946 = vmatmul.mubr.msk.bf16.gmra.mrb[20].mxu0 %vm682_vm3, %v5017_v16  ;;  %v1826_v60 = vor.u32 %v1825_v36, %v1822_v34  ;;  %v1836_v17 = vor.u32 %v1835_v41, %v1831_v4  ;;  %v1841_v27 = vrot.slane %v1839_v59, 5  ;;  %v5097_v21 = vcombine.low %v2051_v30, %v2054_v61  ;;  %v4356_v55 = vld [vmem:[%s4410_s21 + $0x8] sm:$0x1]  ;;  %v5991_v37 = vld [vmem:[#allocation13_spill] sm:$0xff]  ;;  %v5994_v36 = vld [vmem:[#allocation19_spill] sm:$0xff] }
  0x83   : > { %3797 = vmatprep.mubr.msk.bf16.mxu1 %vm682_vm3, %v5006_v63  ;;  %3949 = vmatprep.mubr.msk.bf16.mxu0 %vm682_vm3, %v5024_v8  ;;  %v2498_v9 = vsel %vm731_vm0, %v5990_v46, 0  ;;  %v1209_v7 = vrot.slane %v4355_v45, 5  ;;  %v1212_v52 = vrot.slane %v4356_v55, 5  ;;  %v3437_v2 = vrot.slane %v4357_v12, 9  ;;  %v4358_v34 = vld [vmem:[%s5929_s1 + $0x8] sm:$0x3] }
  0x84   : > { %v1827_v42 = vrot.slane %v1826_v60, 4  ;;  %v1837_v28 = vrot.slane %v1836_v17, 4  ;;  %v1624_v14 = vsel %vm731_vm0, %v4974_v54, 0  ;;  %v5993_v54 = vld [vmem:[#allocation17_spill] sm:$0xff]  ;;  %v5996_v60 = vld [vmem:[#allocation23_spill] sm:$0xff]  ;;  %v2710_v30 = vsel %vm731_vm0, %v3578_v18, 0 }
  0x85   : > { %v1211_v47 = vrot.slane %v1209_v7, 4  ;;  %v1210_v33 = vsel %vm4657_vm7, %v3437_v2, %v1209_v7  ;;  %v5995_v41 = vld [vmem:[#allocation21_spill] sm:$0xff]  ;;  %v5998_v61 = vld [vmem:[#allocation6_spill] sm:$0xff]  ;;  %v6002_v29 = vld [vmem:[#allocation11_spill] sm:$0xff] }
  0x86   : > { %v1832_v48 = vsel %vm4464_vm4, %v1827_v42, %v1831_v4  ;;  %v1842_v24 = vsel %vm4464_vm4, %v1837_v28, %v1841_v27  ;;  %v5185_v4 = vcombine.low %v5061_v53, %v5041_v10  ;;  %v5196_v17 = vld [vmem:[%s4410_s21 + $0xcc] sm:$0xf]  ;;  %v5199_v59 = vld [vmem:[%s4410_s21 + $0xd0] sm:$0xf]  ;;  %v5999_v42 = vld [vmem:[#allocation8_spill] sm:$0xff] }
  0x87   : > { %v5107_v13 = vcombine.low %v1832_v48, %v1842_v24  ;;  %v1213_v0 = vsel %vm4657_vm7, %v1211_v47, %v1212_v52  ;;  %v3542_v10 = vcombine.low %v5196_v17, %v5199_v59  ;;  %v5997_v53 = vld [vmem:[#allocation5_spill] sm:$0xff]  ;;  %v6001_v27 = vld [vmem:[#allocation10_spill] sm:$0xff]  ;;  %v6003_v48 = vld [vmem:[#allocation12_spill] sm:$0xff]  ;;  %v2469_v45 = vshll.u32 %v5196_v17, 16 }
  0x88   : > { %v3454_v51 = vcombine.low %v1210_v33, %v1213_v0  ;;  %v6000_v28 = vld [vmem:[#allocation9_spill] sm:$0xff]  ;;  %v6004_v24 = vld [vmem:[#allocation15_spill] sm:$0xff]  ;;  %v6005_v46 = vld [vmem:[#allocation18_spill] sm:$0xff]  ;;  %v2479_v7 = vshrl.u32 %v5199_v59, 16  ;;  %v2696_v31 = vrot.slane %v5199_v59, 5 }
  0x89   : > { %v6007_v55 = vld [vmem:[#allocation4_spill] sm:$0xff]  ;;  %v6008_v52 = vld [vmem:[#allocation22_spill] sm:$0xff]  ;;  %v2471_v12 = vrot.slane %v2469_v45, 5 }
  0x8a   : > { %3798 = vmatmul.mubr.msk.bf16.gmra.mrb[8].mxu1 %vm682_vm3, %v5066_v22  ;;  %3950 = vmatmul.mubr.msk.bf16.gmra.mrb[24].mxu0 %vm682_vm3, %v5068_v26  ;;  %v2481_v47 = vrot.slane %v2479_v7, 4  ;;  %v243_v33 = vld [vmem:[%s4410_s21 + $0xd4] sm:$0x1]  ;;  %v6009_v0 = vld [vmem:[#allocation24_spill] sm:$0xff]  ;;  %s5363_s21 = scalar_lea.vmem %s5932_s4, %s3596_s18 }
  0x8b   : > { %3801 = vmatprep.mubr.msk.bf16.mxu1 %vm682_vm3, %v5072_v50  ;;  %3953 = vmatprep.mubr.msk.bf16.mxu0 %vm682_vm3, %v5078_v56 }
  0x92   : > { %3802 = vmatmul.mubr.msk.bf16.gmra.mrb[12].mxu1 %vm682_vm3, %v5095_v62  ;;  %3954 = vmatmul.mubr.msk.bf16.gmra.mrb[28].mxu0 %vm682_vm3, %v5097_v21 }
  0x93   : > { %3805 = vmatprep.mubr.msk.bf16.mxu1 %vm682_vm3, %v5105_v43  ;;  %3959 = vmatprep.mubr.msk.bf16.mxu0 %vm682_vm3, %v4963_v3 }
  0x9a   : > { %3806 = vmatmul.mubr.msk.bf16.gmra.mrb[16].mxu1 %vm682_vm3, %v5000_v58  ;;  %3960 = vmatmul.mubr.msk.bf16.vlgmr.msra.gmra.mrb[0].mxu0 %vm682_vm3, %v4985_v40 }
  0x9b   : > { %3992 = vmatpush3.bf16.msra.mxu0 %v2498_v9  ;;  %3809 = vmatprep.mubr.msk.bf16.mxu1 %vm682_vm3, %v5011_v38  ;;  %v6006_v9 = vld [vmem:[#allocation20_spill] sm:$0xff] }
  0x9c   : > { %3963 = vmatprep.mubr.msk.bf16.mxu0 %vm682_vm3, %v5006_v63  ;;  %4326 = vmatprep.subr.msk.bf16.mxu0 %vm731_vm0, %v3578_v18  ;;  %v2466_v18 = vshrl.u32 %v5196_v17, 16 }
  0xa2   : > { %3810 = vmatmul.mubr.msk.bf16.gmra.mrb[20].mxu1 %vm682_vm3, %v5015_v39  ;;  %3964 = vmatmul.mubr.msk.bf16.gmra.mrb[4].mxu0 %vm682_vm3, %v5066_v22 }
  0xa3   : > { %3813 = vmatprep.mubr.msk.bf16.mxu1 %vm682_vm3, %v5022_v44  ;;  %3967 = vmatprep.mubr.msk.bf16.mxu0 %vm682_vm3, %v5072_v50 }
  0xaa   : > { %3814 = vmatmul.mubr.msk.bf16.gmra.mrb[24].mxu1 %vm682_vm3, %v5028_v23  ;;  %3968 = vmatmul.mubr.msk.bf16.gmra.mrb[8].mxu0 %vm682_vm3, %v5095_v62 }
  0xab   : > { %3817 = vmatprep.mubr.msk.bf16.mxu1 %vm682_vm3, %v5032_v1  ;;  %3971 = vmatprep.mubr.msk.bf16.mxu0 %vm682_vm3, %v5105_v43 }
  0xb2   : > { %3818 = vmatmul.mubr.msk.bf16.gmra.mrb[28].mxu1 %vm682_vm3, %v5036_v32  ;;  %3972 = vmatmul.mubr.msk.bf16.gmra.mrb[12].mxu0 %vm682_vm3, %v5000_v58 }
  0xb3   : > { %3823 = vmatprep.mubr.msk.bf16.mxu1 %vm682_vm3, %v3454_v51  ;;  %3975 = vmatprep.mubr.msk.bf16.mxu0 %vm682_vm3, %v5011_v38 }
  0xba   : > { %3824 = vmatmul.mubr.msk.bf16.vlgmr.msra.gmra.mrb[0].mxu1 %vm682_vm3, %v5991_v37  ;;  %3976 = vmatmul.mubr.msk.bf16.gmra.mrb[16].mxu0 %vm682_vm3, %v5015_v39 }
  0xbb   : > { %3856 = vmatpush3.bf16.msra.mxu1 %v1624_v14  ;;  %3827 = vmatprep.mubr.msk.bf16.mxu1 %vm682_vm3, %v5992_v49  ;;  %v2485_v14 = vshll.u32 %v243_v33, 16 }
  0xbc   : > { %3979 = vmatprep.mubr.msk.bf16.mxu0 %vm682_vm3, %v5022_v44  ;;  %4322 = vmatprep.subr.msk.bf16.mxu1 %vm731_vm0, %v4358_v34 }
  0xc2   : > { %3828 = vmatmul.mubr.msk.bf16.gmra.mrb[4].mxu1 %vm682_vm3, %v5993_v54  ;;  %3980 = vmatmul.mubr.msk.bf16.gmra.mrb[20].mxu0 %vm682_vm3, %v5028_v23 }
  0xc3   : > { %3831 = vmatprep.mubr.msk.bf16.mxu1 %vm682_vm3, %v5994_v36  ;;  %3983 = vmatprep.mubr.msk.bf16.mxu0 %vm682_vm3, %v5032_v1 }
  0xca   : > { %3832 = vmatmul.mubr.msk.bf16.gmra.mrb[8].mxu1 %vm682_vm3, %v5995_v41  ;;  %3984 = vmatmul.mubr.msk.bf16.gmra.mrb[24].mxu0 %vm682_vm3, %v5036_v32 }
  0xcb   : > { %3835 = vmatprep.mubr.msk.bf16.mxu1 %vm682_vm3, %v5996_v60  ;;  %3987 = vmatprep.mubr.msk.bf16.mxu0 %vm682_vm3, %v5185_v4 }
  0xd2   : > { %3836 = vmatmul.mubr.msk.bf16.gmra.mrb[12].mxu1 %vm682_vm3, %v4901_v11  ;;  %3988 = vmatmul.mubr.msk.bf16.gmra.mrb[28].mxu0 %vm682_vm3, %v3542_v10  ;;  %v2487_v10 = vrot.slane %v2485_v14, 5 }
  0xd3   : > { %3839 = vmatprep.mubr.msk.bf16.mxu1 %vm682_vm3, %v4931_v6  ;;  %3993 = vmatprep.mubr.msk.bf16.mxu0 %vm682_vm3, %v5997_v53 }
  0xda   : > { %3840 = vmatmul.mubr.msk.bf16.gmra.mrb[16].mxu1 %vm682_vm3, %v4935_v19  ;;  %3994 = vmatmul.mubr.msk.bf16.vlgmr.msra.gmra.mrb[0].mxu0 %vm682_vm3, %v5998_v61 }
  0xdb   : > { %4026 = vmatpush3.bf16.msra.mxu0 %v2710_v30  ;;  %3843 = vmatprep.mubr.msk.bf16.mxu1 %vm682_vm3, %v4957_v57 }
  0xdc   : > { %3997 = vmatprep.mubr.msk.bf16.mxu0 %vm682_vm3, %v5999_v42 }
  0xe2   : > { %3844 = vmatmul.mubr.msk.bf16.gmra.mrb[20].mxu1 %vm682_vm3, %v4967_v20  ;;  %3998 = vmatmul.mubr.msk.bf16.gmra.mrb[4].mxu0 %vm682_vm3, %v6000_v28 }
  0xe3   : > { %3847 = vmatprep.mubr.msk.bf16.mxu1 %vm682_vm3, %v5017_v16  ;;  %4001 = vmatprep.mubr.msk.bf16.mxu0 %vm682_vm3, %v6001_v27 }
  0xea   : > { %3848 = vmatmul.mubr.msk.bf16.gmra.mrb[24].mxu1 %vm682_vm3, %v5024_v8  ;;  %4002 = vmatmul.mubr.msk.bf16.gmra.mrb[8].mxu0 %vm682_vm3, %v6002_v29 }
  0xeb   : > { %3851 = vmatprep.mubr.msk.bf16.mxu1 %vm682_vm3, %v5068_v26  ;;  %4005 = vmatprep.mubr.msk.bf16.mxu0 %vm682_vm3, %v6003_v48 }
  0xf2   : > { %3852 = vmatmul.mubr.msk.bf16.gmra.mrb[28].mxu1 %vm682_vm3, %v5078_v56  ;;  %4006 = vmatmul.mubr.msk.bf16.gmra.mrb[12].mxu0 %vm682_vm3, %v6004_v24 }
  0xf3   : > { %3857 = vmatprep.mubr.msk.bf16.mxu1 %vm682_vm3, %v4470_v35  ;;  %4009 = vmatprep.mubr.msk.bf16.mxu0 %vm682_vm3, %v6005_v46  ;;  %v2475_v35 = vshll.u32 %v5199_v59, 16 }
  0xf5   : > { %v2477_v2 = vrot.slane %v2475_v35, 5 }
  0xf7   : > { %v2482_v51 = vor.u32 %v2481_v47, %v2477_v2 }
  0xf9   : > { %v2483_v34 = vrot.slane %v2482_v51, 4 }
  0xfa   : > { %3858 = vmatmul.mubr.msk.bf16.vlgmr.msra.gmra.mrb[0].mxu1 %vm682_vm3, %v4963_v3  ;;  %4010 = vmatmul.mubr.msk.bf16.gmra.mrb[16].mxu0 %vm682_vm3, %v6006_v9  ;;  %v2468_v3 = vrot.slane %v2466_v18, 4 }
  0xfb   : > { %4060 = vmatpush3.bf16.msra.mxu1 %v6007_v55  ;;  %3861 = vmatprep.mubr.msk.bf16.mxu1 %vm682_vm3, %v4985_v40 }
  0xfc   : > { %4013 = vmatprep.mubr.msk.bf16.mxu0 %vm682_vm3, %v6008_v52  ;;  %v2472_v40 = vor.u32 %v2471_v12, %v2468_v3 }
  0xfe   : > { %v2473_v37 = vrot.slane %v2472_v40, 4 }
 0x102   : > { %3862 = vmatmul.mubr.msk.bf16.gmra.mrb[4].mxu1 %vm682_vm3, %v5006_v63  ;;  %4014 = vmatmul.mubr.msk.bf16.gmra.mrb[20].mxu0 %vm682_vm3, %v6009_v0  ;;  %v2478_v63 = vsel %vm4464_vm4, %v2473_v37, %v2477_v2 }
 0x103   : > { %3865 = vmatprep.mubr.msk.bf16.mxu1 %vm682_vm3, %v5066_v22  ;;  %4017 = vmatprep.mubr.msk.bf16.mxu0 %vm682_vm3, %v4897_v15  ;;  %v2488_v22 = vsel %vm4464_vm4, %v2483_v34, %v2487_v10 }
 0x104   : > { %v3560_v53 = vcombine.low %v2478_v63, %v2488_v22 }
 0x10a   : > { %3866 = vmatmul.mubr.msk.bf16.gmra.mrb[8].mxu1 %vm682_vm3, %v5072_v50  ;;  %4018 = vmatmul.mubr.msk.bf16.gmra.mrb[24].mxu0 %vm682_vm3, %v4929_v5 }
 0x10b   : > { %3869 = vmatprep.mubr.msk.bf16.mxu1 %vm682_vm3, %v5095_v62  ;;  %4021 = vmatprep.mubr.msk.bf16.mxu0 %vm682_vm3, %v5107_v13 }
 0x112   : > { %3870 = vmatmul.mubr.msk.bf16.gmra.mrb[12].mxu1 %vm682_vm3, %v5105_v43  ;;  %4022 = vmatmul.mubr.msk.bf16.gmra.mrb[28].mxu0 %vm682_vm3, %v3560_v53 }
 0x113   : > { %3873 = vmatprep.mubr.msk.bf16.mxu1 %vm682_vm3, %v5000_v58  ;;  %4027 = vmatprep.mubr.msk.bf16.mxu0 %vm682_vm3, %v5992_v49 }
 0x11a   : > { %3874 = vmatmul.mubr.msk.bf16.gmra.mrb[16].mxu1 %vm682_vm3, %v5011_v38  ;;  %4028 = vmatmul.mubr.msk.bf16.vlgmr.msra.gmra.mrb[0].mxu0 %vm682_vm3, %v5993_v54 }
 0x11b   : > { %3877 = vmatprep.mubr.msk.bf16.mxu1 %vm682_vm3, %v5015_v39  ;;  %4031 = vmatprep.mubr.msk.bf16.mxu0 %vm682_vm3, %v5994_v36 }
 0x122   : > { %3878 = vmatmul.mubr.msk.bf16.gmra.mrb[20].mxu1 %vm682_vm3, %v5022_v44  ;;  %4032 = vmatmul.mubr.msk.bf16.gmra.mrb[4].mxu0 %vm682_vm3, %v5995_v41 }
 0x123   : > { %3881 = vmatprep.mubr.msk.bf16.mxu1 %vm682_vm3, %v5028_v23  ;;  %4035 = vmatprep.mubr.msk.bf16.mxu0 %vm682_vm3, %v5996_v60 }
 0x12a   : > { %3882 = vmatmul.mubr.msk.bf16.gmra.mrb[24].mxu1 %vm682_vm3, %v5032_v1  ;;  %4036 = vmatmul.mubr.msk.bf16.gmra.mrb[8].mxu0 %vm682_vm3, %v4901_v11  ;;  %v3577_v11 = vrot.slane %v5196_v17, 9 }
 0x12b   : > { %3885 = vmatprep.mubr.msk.bf16.mxu1 %vm682_vm3, %v5036_v32  ;;  %4039 = vmatprep.mubr.msk.bf16.mxu0 %vm682_vm3, %v4931_v6  ;;  %v2698_v6 = vrot.slane %v2696_v31, 4 }
 0x132   : > { %3886 = vmatmul.mubr.msk.bf16.gmra.mrb[28].mxu1 %vm682_vm3, %v5185_v4  ;;  %4040 = vmatmul.mubr.msk.bf16.gmra.mrb[12].mxu0 %vm682_vm3, %v4935_v19  ;;  %v2699_v19 = vrot.slane %v243_v33, 5 }
 0x133   : > { %3907 = vmatprep.mubr.msk.bf16.mxu1 %vm682_vm3, %v6004_v24  ;;  %4043 = vmatprep.mubr.msk.bf16.mxu0 %vm682_vm3, %v4957_v57  ;;  %v2697_v57 = vsel %vm4657_vm7, %v3577_v11, %v2696_v31 }
 0x13a   : > { %3908 = vmatmul.mubr.msk.bf16.vlgmr.msra.gmra.mrb[16].mxu1 %vm682_vm3, %v6005_v46  ;;  %4044 = vmatmul.mubr.msk.bf16.gmra.mrb[16].mxu0 %vm682_vm3, %v4967_v20  ;;  %v2700_v20 = vsel %vm4657_vm7, %v2698_v6, %v2699_v19 }
 0x13b   : > { %3911 = vmatprep.mubr.msk.bf16.mxu1 %vm682_vm3, %v6006_v9  ;;  %4047 = vmatprep.mubr.msk.bf16.mxu0 %vm682_vm3, %v5017_v16  ;;  %v3579_v58 = vcombine.low %v2697_v57, %v2700_v20 }
 0x142   : > { %3912 = vmatmul.mubr.msk.bf16.gmra.mrb[20].mxu1 %vm682_vm3, %v6008_v52  ;;  %4048 = vmatmul.mubr.msk.bf16.gmra.mrb[20].mxu0 %vm682_vm3, %v5024_v8 }
 0x143   : > { %3915 = vmatprep.mubr.msk.bf16.mxu1 %vm682_vm3, %v6009_v0  ;;  %4051 = vmatprep.mubr.msk.bf16.mxu0 %vm682_vm3, %v5068_v26 }
 0x14a   : > { %3916 = vmatmul.mubr.msk.bf16.gmra.mrb[24].mxu1 %vm682_vm3, %v4897_v15  ;;  %4052 = vmatmul.mubr.msk.bf16.gmra.mrb[24].mxu0 %vm682_vm3, %v5078_v56 }
 0x14b   : > { %3919 = vmatprep.mubr.msk.bf16.mxu1 %vm682_vm3, %v4929_v5  ;;  %4055 = vmatprep.mubr.msk.bf16.mxu0 %vm682_vm3, %v5097_v21 }
 0x152   : > { %3920 = vmatmul.mubr.msk.bf16.gmra.mrb[28].mxu1 %vm682_vm3, %v5107_v13  ;;  %4056 = vmatmul.mubr.msk.bf16.gmra.mrb[28].mxu0 %vm682_vm3, %v3579_v58 }
 0x1cd   : > { %v3859_v15 = vpop.f32.mrb[0].mxu1 }
 0x1ce   : > { %v1660_v38 = vpop.f32.mrb[1].mxu1 }
 0x1cf   : > { %v3860_v39 = vpop.f32.mrb[2].mxu1 }
 0x1d0   : > { %v1663_v5 = vpop.f32.mrb[3].mxu1 }
 0x1d5   : > { %v3863_v16 = vpop.f32.mrb[4].mxu1 }
 0x1d6   : > { %v1676_v44 = vpop.f32.mrb[5].mxu1 }
 0x1d7   : > { %v3864_v8 = vpop.f32.mrb[6].mxu1 }
 0x1d8   : > { %v1679_v23 = vpop.f32.mrb[7].mxu1 }
 0x1dd   : > { %v3867_v1 = vpop.f32.mrb[8].mxu1 }
 0x1de   : > { %v1692_v32 = vpop.f32.mrb[9].mxu1 }
 0x1df   : > { %v3868_v26 = vpop.f32.mrb[10].mxu1 }
 0x1e0   : > { %v5349_v25 = vpop.f32.mrb[11].mxu1 }
 0x1e5   : > { %v5351_v50 = vpop.f32.mrb[12].mxu1 }
 0x1e6   : > { %v5353_v56 = vpop.f32.mrb[13].mxu1 }
 0x1e7   : > { %v5355_v62 = vpop.f32.mrb[14].mxu1 }
 0x1e8   : > { %v5357_v21 = vpop.f32.mrb[15].mxu1 }
 0x1ed   : > { %v4029_v43 = vpop.f32.mrb[0].mxu0 }
 0x1ee   : > { %v4061_v13 = vadd.f32 %v4029_v43, %v3859_v15  ;;  %v2746_v49 = vpop.f32.mrb[1].mxu0 }
 0x1ef   : > { %v4062_v54 = vadd.f32 %v2746_v49, %v1660_v38  ;;  %v4030_v36 = vpop.f32.mrb[2].mxu0 }
 0x1f0   : > { %2909 = vst [vmem:[%s5363_s21 + $0x10] sm:$0xff] %v4061_v13  ;;  %v4063_v4 = vadd.f32 %v4030_v36, %v3860_v39  ;;  %v2749_v41 = vpop.f32.mrb[3].mxu0  ;;  %v2982_v61 = vmul.f32 %v4061_v13, %v4061_v13 }
 0x1f1   : > { %2907 = vst [vmem:[%s5363_s21] sm:$0xff] %v4062_v54  ;;  %v4064_v60 = vadd.f32 %v2749_v41, %v1663_v5  ;;  %v2980_v17 = vmul.f32 %v4062_v54, %v4062_v54 }
 0x1f2   : > { %2910 = vst [vmem:[%s5363_s21 + $0x18] sm:$0xff] %v4063_v4  ;;  %v2983_v24 = vmul.f32 %v4063_v4, %v4063_v4 }
 0x1f3   : > { %2908 = vst [vmem:[%s5363_s21 + $0x8] sm:$0xff] %v4064_v60  ;;  %v2940_v59 = vadd.f32 %v4064_v60, %v4062_v54  ;;  %v2981_v30 = vmul.f32 %v4064_v60, %v4064_v60 }
 0x1f5   : > { %v2941_v42 = vadd.f32 %v4061_v13, %v2940_v59  ;;  %v3012_v28 = vadd.f32 %v2981_v30, %v2980_v17  ;;  %v4033_v27 = vpop.f32.mrb[4].mxu0 }
 0x1f6   : > { %v4065_v29 = vadd.f32 %v4033_v27, %v3863_v16  ;;  %v2762_v48 = vpop.f32.mrb[5].mxu0 }
 0x1f7   : > { %v3013_v46 = vadd.f32 %v3012_v28, %v2982_v61  ;;  %v4066_v9 = vadd.f32 %v2762_v48, %v1676_v44  ;;  %v2942_v18 = vadd.f32 %v4063_v4, %v2941_v42  ;;  %v4034_v45 = vpop.f32.mrb[6].mxu0 }
 0x1f8   : > { %2913 = vst [vmem:[%s5363_s21 + $0x30] sm:$0xff] %v4065_v29  ;;  %v4067_v7 = vadd.f32 %v4034_v45, %v3864_v8  ;;  %v2765_v55 = vpop.f32.mrb[7].mxu0  ;;  %v2986_v0 = vmul.f32 %v4065_v29, %v4065_v29 }
 0x1f9   : > { %2911 = vst [vmem:[%s5363_s21 + $0x20] sm:$0xff] %v4066_v9  ;;  %v2943_v35 = vadd.f32 %v4066_v9, %v2942_v18  ;;  %v2984_v52 = vmul.f32 %v4066_v9, %v4066_v9  ;;  %v3014_v3 = vadd.f32 %v3013_v46, %v2983_v24  ;;  %v4068_v12 = vadd.f32 %v2765_v55, %v1679_v23 }
 0x1fa   : > { %2914 = vst [vmem:[%s5363_s21 + $0x38] sm:$0xff] %v4067_v7  ;;  %v2987_v10 = vmul.f32 %v4067_v7, %v4067_v7 }
 0x1fb   : > { %v3015_v2 = vadd.f32 %v3014_v3, %v2984_v52  ;;  %2912 = vst [vmem:[%s5363_s21 + $0x28] sm:$0xff] %v4068_v12  ;;  %v2944_v47 = vadd.f32 %v4068_v12, %v2943_v35  ;;  %v2985_v33 = vmul.f32 %v4068_v12, %v4068_v12 }
 0x1fd   : > { %v2945_v40 = vadd.f32 %v4065_v29, %v2944_v47  ;;  %v3016_v51 = vadd.f32 %v3015_v2, %v2985_v33  ;;  %v4037_v14 = vpop.f32.mrb[8].mxu0 }
 0x1fe   : > { %v4069_v37 = vadd.f32 %v4037_v14, %v3867_v1  ;;  %v2778_v34 = vpop.f32.mrb[9].mxu0 }
 0x1ff   : > { %v3017_v63 = vadd.f32 %v3016_v51, %v2986_v0  ;;  %v4070_v22 = vadd.f32 %v2778_v34, %v1692_v32  ;;  %v2946_v53 = vadd.f32 %v4067_v7, %v2945_v40  ;;  %v4038_v31 = vpop.f32.mrb[10].mxu0 }
 0x200   : > { %2917 = vst [vmem:[%s5363_s21 + $0x50] sm:$0xff] %v4069_v37  ;;  %v4071_v11 = vadd.f32 %v4038_v31, %v3868_v26  ;;  %v2781_v6 = vpop.f32.mrb[11].mxu0  ;;  %v2990_v5 = vmul.f32 %v4069_v37, %v4069_v37 }
 0x201   : > { %2915 = vst [vmem:[%s5363_s21 + $0x40] sm:$0xff] %v4070_v22  ;;  %v2947_v19 = vadd.f32 %v4070_v22, %v2946_v53  ;;  %v2988_v57 = vmul.f32 %v4070_v22, %v4070_v22  ;;  %v3018_v20 = vadd.f32 %v3017_v63, %v2987_v10  ;;  %v4072_v58 = vadd.f32 %v2781_v6, %v5349_v25 }
 0x202   : > { %2918 = vst [vmem:[%s5363_s21 + $0x58] sm:$0xff] %v4071_v11  ;;  %v2991_v32 = vmul.f32 %v4071_v11, %v4071_v11 }
 0x203   : > { %v3019_v15 = vadd.f32 %v3018_v20, %v2988_v57  ;;  %2916 = vst [vmem:[%s5363_s21 + $0x48] sm:$0xff] %v4072_v58  ;;  %v2948_v38 = vadd.f32 %v4072_v58, %v2947_v19  ;;  %v2989_v39 = vmul.f32 %v4072_v58, %v4072_v58 }
 0x205   : > { %v2949_v16 = vadd.f32 %v4069_v37, %v2948_v38  ;;  %v3020_v44 = vadd.f32 %v3019_v15, %v2989_v39  ;;  %v4041_v8 = vpop.f32.mrb[12].mxu0 }
 0x206   : > { %v4073_v23 = vadd.f32 %v4041_v8, %v5351_v50  ;;  %v2794_v1 = vpop.f32.mrb[13].mxu0 }
 0x207   : > { %v3021_v26 = vadd.f32 %v3020_v44, %v2990_v5  ;;  %v4074_v25 = vadd.f32 %v2794_v1, %v5353_v56  ;;  %v2950_v43 = vadd.f32 %v4071_v11, %v2949_v16  ;;  %v4042_v13 = vpop.f32.mrb[14].mxu0 }
 0x208   : > { %2921 = vst [vmem:[%s5363_s21 + $0x70] sm:$0xff] %v4073_v23  ;;  %v4075_v49 = vadd.f32 %v4042_v13, %v5355_v62  ;;  %v2797_v54 = vpop.f32.mrb[15].mxu0  ;;  %v2994_v30 = vmul.f32 %v4073_v23, %v4073_v23 }
 0x209   : > { %2919 = vst [vmem:[%s5363_s21 + $0x60] sm:$0xff] %v4074_v25  ;;  %v2951_v36 = vadd.f32 %v4074_v25, %v2950_v43  ;;  %v2992_v4 = vmul.f32 %v4074_v25, %v4074_v25  ;;  %v3022_v41 = vadd.f32 %v3021_v26, %v2991_v32  ;;  %v4076_v60 = vadd.f32 %v2797_v54, %v5357_v21 }
 0x20a   : > { %2922 = vst [vmem:[%s5363_s21 + $0x78] sm:$0xff] %v4075_v49  ;;  %v2995_v48 = vmul.f32 %v4075_v49, %v4075_v49 }
 0x20b   : > { %v3023_v50 = vadd.f32 %v3022_v41, %v2992_v4  ;;  %2920 = vst [vmem:[%s5363_s21 + $0x68] sm:$0xff] %v4076_v60  ;;  %v2952_v17 = vadd.f32 %v4076_v60, %v2951_v36  ;;  %v2993_v59 = vmul.f32 %v4076_v60, %v4076_v60 }
 0x20d   : > { %v2953_v56 = vadd.f32 %v4073_v23, %v2952_v17  ;;  %v3024_v61 = vadd.f32 %v3023_v50, %v2993_v59  ;;  %v3909_v42 = vpop.f32.mrb[16].mxu1  ;;  %v4045_v28 = vpop.f32.mrb[16].mxu0 }
 0x20e   : > { %v4077_v62 = vadd.f32 %v4045_v28, %v3909_v42  ;;  %v1952_v27 = vpop.f32.mrb[17].mxu1  ;;  %v2810_v29 = vpop.f32.mrb[17].mxu0 }
 0x20f   : > { %v3025_v24 = vadd.f32 %v3024_v61, %v2994_v30  ;;  %v4078_v21 = vadd.f32 %v2810_v29, %v1952_v27  ;;  %v2954_v46 = vadd.f32 %v4075_v49, %v2953_v56  ;;  %v3910_v9 = vpop.f32.mrb[18].mxu1  ;;  %v4046_v18 = vpop.f32.mrb[18].mxu0 }
 0x210   : > { %2925 = vst [vmem:[%s5363_s21 + $0x90] sm:$0xff] %v4077_v62  ;;  %v4079_v45 = vadd.f32 %v4046_v18, %v3910_v9  ;;  %v1955_v7 = vpop.f32.mrb[19].mxu1  ;;  %v2813_v55 = vpop.f32.mrb[19].mxu0  ;;  %v2998_v0 = vmul.f32 %v4077_v62, %v4077_v62 }
 0x211   : > { %2923 = vst [vmem:[%s5363_s21 + $0x80] sm:$0xff] %v4078_v21  ;;  %v2955_v35 = vadd.f32 %v4078_v21, %v2954_v46  ;;  %v2996_v52 = vmul.f32 %v4078_v21, %v4078_v21  ;;  %v3026_v3 = vadd.f32 %v3025_v24, %v2995_v48  ;;  %v4080_v12 = vadd.f32 %v2813_v55, %v1955_v7 }
 0x212   : > { %2926 = vst [vmem:[%s5363_s21 + $0x98] sm:$0xff] %v4079_v45  ;;  %v2999_v22 = vmul.f32 %v4079_v45, %v4079_v45 }
 0x213   : > { %v3027_v2 = vadd.f32 %v3026_v3, %v2996_v52  ;;  %2924 = vst [vmem:[%s5363_s21 + $0x88] sm:$0xff] %v4080_v12  ;;  %v2956_v47 = vadd.f32 %v4080_v12, %v2955_v35  ;;  %v2997_v33 = vmul.f32 %v4080_v12, %v4080_v12 }
 0x215   : > { %v2957_v40 = vadd.f32 %v4077_v62, %v2956_v47  ;;  %v3028_v51 = vadd.f32 %v3027_v2, %v2997_v33  ;;  %v3913_v14 = vpop.f32.mrb[20].mxu1  ;;  %v4049_v37 = vpop.f32.mrb[20].mxu0 }
 0x216   : > { %v4081_v34 = vadd.f32 %v4049_v37, %v3913_v14  ;;  %v1968_v10 = vpop.f32.mrb[21].mxu1  ;;  %v2826_v63 = vpop.f32.mrb[21].mxu0 }
 0x217   : > { %v3029_v53 = vadd.f32 %v3028_v51, %v2998_v0  ;;  %v4082_v31 = vadd.f32 %v2826_v63, %v1968_v10  ;;  %v2958_v11 = vadd.f32 %v4079_v45, %v2957_v40  ;;  %v3914_v6 = vpop.f32.mrb[22].mxu1  ;;  %v4050_v19 = vpop.f32.mrb[22].mxu0 }
 0x218   : > { %2929 = vst [vmem:[%s5363_s21 + $0xb0] sm:$0xff] %v4081_v34  ;;  %v4083_v57 = vadd.f32 %v4050_v19, %v3914_v6  ;;  %v1971_v20 = vpop.f32.mrb[23].mxu1  ;;  %v2829_v58 = vpop.f32.mrb[23].mxu0  ;;  %v3002_v23 = vmul.f32 %v4081_v34, %v4081_v34 }
 0x219   : > { %2927 = vst [vmem:[%s5363_s21 + $0xa0] sm:$0xff] %v4082_v31  ;;  %v2959_v15 = vadd.f32 %v4082_v31, %v2958_v11  ;;  %v3000_v38 = vmul.f32 %v4082_v31, %v4082_v31  ;;  %v3030_v39 = vadd.f32 %v3029_v53, %v2999_v22  ;;  %v4084_v5 = vadd.f32 %v2829_v58, %v1971_v20 }
 0x21a   : > { %2930 = vst [vmem:[%s5363_s21 + $0xb8] sm:$0xff] %v4083_v57  ;;  %v3003_v54 = vmul.f32 %v4083_v57, %v4083_v57 }
 0x21b   : > { %v3031_v16 = vadd.f32 %v3030_v39, %v3000_v38  ;;  %2928 = vst [vmem:[%s5363_s21 + $0xa8] sm:$0xff] %v4084_v5  ;;  %v2960_v44 = vadd.f32 %v4084_v5, %v2959_v15  ;;  %v3001_v8 = vmul.f32 %v4084_v5, %v4084_v5 }
 0x21d   : > { %v2961_v1 = vadd.f32 %v4081_v34, %v2960_v44  ;;  %v3032_v32 = vadd.f32 %v3031_v16, %v3001_v8  ;;  %v3917_v26 = vpop.f32.mrb[24].mxu1  ;;  %v4053_v25 = vpop.f32.mrb[24].mxu0 }
 0x21e   : > { %v4085_v43 = vadd.f32 %v4053_v25, %v3917_v26  ;;  %v1984_v13 = vpop.f32.mrb[25].mxu1  ;;  %v2842_v49 = vpop.f32.mrb[25].mxu0  ;;  %v2979_v26 = vld [vmem:[#allocation3] sm:$0x1] }
 0x21f   : > { %v3033_v36 = vadd.f32 %v3032_v32, %v3002_v23  ;;  %v4086_v4 = vadd.f32 %v2842_v49, %v1984_v13  ;;  %v2962_v41 = vadd.f32 %v4083_v57, %v2961_v1  ;;  %v3918_v60 = vpop.f32.mrb[26].mxu1  ;;  %v4054_v50 = vpop.f32.mrb[26].mxu0  ;;  %v2939_v23 = vld [vmem:[#allocation2] sm:$0x1] }
 0x220   : > { %2933 = vst [vmem:[%s5363_s21 + $0xd0] sm:$0xff] %v4085_v43  ;;  %v4087_v17 = vadd.f32 %v4054_v50, %v3918_v60  ;;  %v1987_v59 = vpop.f32.mrb[27].mxu1  ;;  %v2845_v30 = vpop.f32.mrb[27].mxu0  ;;  %v3006_v48 = vmul.f32 %v4085_v43, %v4085_v43 }
 0x221   : > { %2931 = vst [vmem:[%s5363_s21 + $0xc0] sm:$0xff] %v4086_v4  ;;  %v2963_v56 = vadd.f32 %v4086_v4, %v2962_v41  ;;  %v3004_v61 = vmul.f32 %v4086_v4, %v4086_v4  ;;  %v3034_v42 = vadd.f32 %v3033_v36, %v3003_v54  ;;  %v4088_v28 = vadd.f32 %v2845_v30, %v1987_v59  ;;  %v3063_v30 = vld [vmem:[%s5930_s2] sm:$0x1] (!%p3597_p5) }
 0x222   : > { %2934 = vst [vmem:[%s5363_s21 + $0xd8] sm:$0xff] %v4087_v17  ;;  %v3007_v55 = vmul.f32 %v4087_v17, %v4087_v17 }
 0x223   : > { %v3035_v62 = vadd.f32 %v3034_v42, %v3004_v61  ;;  %2932 = vst [vmem:[%s5363_s21 + $0xc8] sm:$0xff] %v4088_v28  ;;  %v2964_v27 = vadd.f32 %v4088_v28, %v2963_v56  ;;  %v3005_v29 = vmul.f32 %v4088_v28, %v4088_v28  ;;  %v3065_v28 = vld [vmem:[%s5931_s3] sm:$0x1] (!%p3597_p5) }
 0x225   : > { %v2965_v24 = vadd.f32 %v4085_v43, %v2964_v27  ;;  %v3036_v21 = vadd.f32 %v3035_v62, %v3005_v29  ;;  %v3921_v46 = vpop.f32.mrb[28].mxu1  ;;  %v4057_v9 = vpop.f32.mrb[28].mxu0 }
 0x226   : > { %v4089_v18 = vadd.f32 %v4057_v9, %v3921_v46  ;;  %v2000_v45 = vpop.f32.mrb[29].mxu1  ;;  %v2858_v7 = vpop.f32.mrb[29].mxu0 }
 0x227   : > { %v3037_v35 = vadd.f32 %v3036_v21, %v3006_v48  ;;  %v4090_v52 = vadd.f32 %v2858_v7, %v2000_v45  ;;  %v2966_v3 = vadd.f32 %v4087_v17, %v2965_v24  ;;  %v3922_v12 = vpop.f32.mrb[30].mxu1  ;;  %v4058_v2 = vpop.f32.mrb[30].mxu0  ;;  %v3133_v17 = vlaneseq (!%p3597_p5) }
 0x228   : > { %2937 = vst [vmem:[%s5363_s21 + $0xf0] sm:$0xff] %v4089_v18  ;;  %v4091_v47 = vadd.f32 %v4058_v2, %v3922_v12  ;;  %v2003_v33 = vpop.f32.mrb[31].mxu1  ;;  %v2861_v0 = vpop.f32.mrb[31].mxu0  ;;  %v3010_v22 = vmul.f32 %v4089_v18, %v4089_v18 }
 0x229   : > { %2935 = vst [vmem:[%s5363_s21 + $0xe0] sm:$0xff] %v4090_v52  ;;  %v2967_v40 = vadd.f32 %v4090_v52, %v2966_v3  ;;  %v3008_v51 = vmul.f32 %v4090_v52, %v4090_v52  ;;  %v3038_v14 = vadd.f32 %v3037_v35, %v3007_v55  ;;  %v4092_v37 = vadd.f32 %v2861_v0, %v2003_v33 }
 0x22a   : > { %2938 = vst [vmem:[%s5363_s21 + $0xf8] sm:$0xff] %v4091_v47  ;;  %v3011_v11 = vmul.f32 %v4091_v47, %v4091_v47  ;;  %v3134_v59 = vshrl.u32 (!%p3597_p5), %v3133_v17, 7 }
 0x22b   : > { %v3039_v34 = vadd.f32 %v3038_v14, %v3008_v51  ;;  %2936 = vst [vmem:[%s5363_s21 + $0xe8] sm:$0xff] %v4092_v37  ;;  %v2968_v10 = vadd.f32 %v4092_v37, %v2967_v40  ;;  %v3009_v63 = vmul.f32 %v4092_v37, %v4092_v37 }
 0x22c   : > { %v3135_v56 = vsub.s32 (!%p3597_p5), 0, %v3134_v59 }
 0x22d   : > { %v2969_v53 = vadd.f32 %v4089_v18, %v2968_v10  ;;  %v3040_v31 = vadd.f32 %v3039_v34, %v3009_v63 }
 0x22f   : > { %v2970_v6 = vadd.f32 %v4091_v47, %v2969_v53  ;;  %v3041_v19 = vadd.f32 %v3040_v31, %v3010_v22 }
 0x231   : > { %v2971_v57 = vrot.slane %v2970_v6, 4  ;;  %v3042_v20 = vadd.f32 %v3041_v19, %v3011_v11 }
 0x232   : > { %v3068_v62 = vld [vmem:[%s5932_s4] sm:$0xff] (!%p3597_p5)  ;;  %v3069_v27 = vld [vmem:[%s5932_s4 + $0x8] sm:$0xff] (!%p3597_p5)  ;;  %v3070_v29 = vld [vmem:[%s5932_s4 + $0x10] sm:$0xff] (!%p3597_p5) }
 0x233   : > { %v2972_v58 = vadd.f32 %v2971_v57, %v2970_v6  ;;  %v3043_v15 = vrot.slane %v3042_v20, 4  ;;  %v3071_v48 = vld [vmem:[%s5932_s4 + $0x18] sm:$0xff] (!%p3597_p5)  ;;  %v3072_v24 = vld [vmem:[%s5932_s4 + $0x20] sm:$0xff] (!%p3597_p5)  ;;  %v3073_v9 = vld [vmem:[%s5932_s4 + $0x28] sm:$0xff] (!%p3597_p5) }
 0x234   : > { %v3074_v18 = vld [vmem:[%s5932_s4 + $0x30] sm:$0xff] (!%p3597_p5)  ;;  %v3075_v45 = vld [vmem:[%s5932_s4 + $0x38] sm:$0xff] (!%p3597_p5)  ;;  %v3076_v7 = vld [vmem:[%s5932_s4 + $0x40] sm:$0xff] (!%p3597_p5) }
 0x235   : > { %v2973_v38 = vrot.slane %v2972_v58, 2  ;;  %v3044_v39 = vadd.f32 %v3043_v15, %v3042_v20  ;;  %v3077_v55 = vld [vmem:[%s5932_s4 + $0x48] sm:$0xff] (!%p3597_p5)  ;;  %v3078_v35 = vld [vmem:[%s5932_s4 + $0x50] sm:$0xff] (!%p3597_p5)  ;;  %v3079_v47 = vld [vmem:[%s5932_s4 + $0x58] sm:$0xff] (!%p3597_p5) }
 0x236   : > { %v3080_v33 = vld [vmem:[%s5932_s4 + $0x60] sm:$0xff] (!%p3597_p5)  ;;  %v3081_v0 = vld [vmem:[%s5932_s4 + $0x68] sm:$0xff] (!%p3597_p5)  ;;  %v3082_v15 = vld [vmem:[%s5932_s4 + $0x70] sm:$0xff] (!%p3597_p5) }
 0x237   : > { %v2974_v5 = vadd.f32 %v2973_v38, %v2972_v58  ;;  %v3045_v16 = vrot.slane %v3044_v39, 2  ;;  %v3083_v38 = vld [vmem:[%s5932_s4 + $0x78] sm:$0xff] (!%p3597_p5) }
 0x239   : > { %v2975_v44 = vrot.slane %v2974_v5, 1  ;;  %v3046_v8 = vadd.f32 %v3045_v16, %v3044_v39  ;;  %v3084_v39 = vld [vmem:[%s5932_s4 + $0x80] sm:$0xff] (!%p3597_p5) }
 0x23b   : > { %v2976_v1 = vadd.f32 %v2975_v44, %v2974_v5  ;;  %v3047_v32 = vrot.slane %v3046_v8, 1  ;;  %3054 = sbr.rel (%p3597_p5) target bundleno = 649 (0x289), region = 44 }
 0x23d   : > { %v2977_v25 = vadd.f32 %v2976_v1, %v2939_v23  ;;  %v3048_v43 = vadd.f32 %v3047_v32, %v3046_v8  ;;  %v3085_v23 = vld [vmem:[%s5932_s4 + $0x88] sm:$0xff] (!%p3597_p5)  ;;  %v3086_v1 = vld [vmem:[%s5932_s4 + $0x90] sm:$0xff] (!%p3597_p5)  ;;  %v3087_v32 = vld [vmem:[%s5932_s4 + $0x98] sm:$0xff] (!%p3597_p5) }
 0x23f   : > { %2978 = vst [vmem:[#allocation2] sm:$0x1] %v2977_v25  ;;  %v3049_v13 = vadd.f32 %v3048_v43, %v2979_v26 }
 0x241   : > { %3050 = vst [vmem:[#allocation3] sm:$0x1] %v3049_v13 }
 0x246   : > { %v3055_v49 = vld [vmem:[#allocation2] sm:$0x1] }
 0x247   : > { %v3056_v36 = vmul.f32 0.001953125, %v3055_v49  ;;  %v3088_v49 = vld [vmem:[%s5932_s4 + $0xa0] sm:$0xff] }
 0x248   : > { %v3057_v54 = vld [vmem:[#allocation3] sm:$0x1] }
 0x249   : > { %v3058_v4 = vmul.f32 0.001953125, %v3057_v54  ;;  %v3059_v41 = vmul.f32 %v3056_v36, %v3056_v36  ;;  %v3089_v54 = vld [vmem:[%s5932_s4 + $0xa8] sm:$0xff] }
 0x24b   : > { %v3060_v60 = vsub.f32 %v3058_v4, %v3059_v41 }
 0x24d   : > { %v3061_v50 = vadd.f32 1e-05, %v3060_v60 }
 0x24f   : > { %4359 = vrsqrt.f32 %v3061_v50 }
 0x259   : > { %v4360_v61 = vpop.eup %4359 }
 0x25a   : > { %v3064_v42 = vmul.f32 %v4360_v61, %v3063_v30  ;;  %v3091_v61 = vld [vmem:[%s5932_s4 + $0xb8] sm:$0xff] }
 0x25c   : > { %v3066_v21 = vmul.f32 %v3064_v42, %v3056_v36  ;;  %v5424_v46 = vrot.slane %v3064_v42, %v3135_v56  ;;  %v3092_v42 = vld [vmem:[%s5932_s4 + $0xc0] sm:$0xff] }
 0x25e   : > { %v3067_v52 = vsub.f32 %v3065_v28, %v3066_v21  ;;  %v3138_v3 = vmul.f32 %v5424_v46, %v3068_v62  ;;  %v3139_v12 = vmul.f32 %v5424_v46, %v3069_v27  ;;  %v3140_v2 = vmul.f32 %v5424_v46, %v3070_v29  ;;  %v3095_v21 = vld [vmem:[%s5932_s4 + $0xd8] sm:$0xff] }
 0x25f   : > { %v3141_v40 = vmul.f32 %v5424_v46, %v3071_v48  ;;  %v3142_v51 = vmul.f32 %v5424_v46, %v3072_v24  ;;  %v3143_v14 = vmul.f32 %v5424_v46, %v3073_v9  ;;  %v3144_v37 = vmul.f32 %v5424_v46, %v3074_v18  ;;  %v3093_v48 = vld [vmem:[%s5932_s4 + $0xc8] sm:$0xff]  ;;  %v3094_v24 = vld [vmem:[%s5932_s4 + $0xd0] sm:$0xff] }
 0x260   : > { %v5460_v34 = vrot.slane %v3067_v52, %v3135_v56  ;;  %v3145_v10 = vmul.f32 %v5424_v46, %v3075_v45  ;;  %v3146_v63 = vmul.f32 %v5424_v46, %v3076_v7  ;;  %v3147_v22 = vmul.f32 %v5424_v46, %v3077_v55  ;;  %v3090_v56 = vld [vmem:[%s5932_s4 + $0xb0] sm:$0xff]  ;;  %v3096_v55 = vld [vmem:[%s5932_s4 + $0xe0] sm:$0xff] }
 0x261   : > { %v3148_v53 = vmul.f32 %v5424_v46, %v3078_v35  ;;  %v3149_v31 = vmul.f32 %v5424_v46, %v3079_v47  ;;  %v3150_v11 = vmul.f32 %v5424_v46, %v3080_v33  ;;  %v3151_v6 = vmul.f32 %v5424_v46, %v3081_v0  ;;  %v3097_v35 = vld [vmem:[%s5932_s4 + $0xe8] sm:$0xff] }
 0x262   : > { %v3208_v19 = vadd.f32 %v5460_v34, %v3138_v3  ;;  %v3209_v57 = vadd.f32 %v5460_v34, %v3139_v12  ;;  %v3210_v20 = vadd.f32 %v5460_v34, %v3140_v2  ;;  %v3211_v58 = vadd.f32 %v5460_v34, %v3141_v40 }
 0x263   : > { %v3212_v5 = vadd.f32 %v5460_v34, %v3142_v51  ;;  %v3213_v16 = vadd.f32 %v5460_v34, %v3143_v14  ;;  %v3214_v44 = vadd.f32 %v5460_v34, %v3144_v37  ;;  %v3215_v8 = vadd.f32 %v5460_v34, %v3145_v10  ;;  %v3098_v51 = vld [vmem:[%s5932_s4 + $0xf0] sm:$0xff]  ;;  %v3099_v14 = vld [vmem:[%s5932_s4 + $0xf8] sm:$0xff]  ;;  %v3100_v37 = vld [vmem:[%s5932_s4 + $0x100] sm:$0xff] }
 0x264   : > { %3272 = vst [vmem:[%s5932_s4] sm:$0xff] %v3208_v19  ;;  %3273 = vst [vmem:[%s5932_s4 + $0x8] sm:$0xff] %v3209_v57  ;;  %v3216_v26 = vadd.f32 %v5460_v34, %v3146_v63  ;;  %v3217_v25 = vadd.f32 %v5460_v34, %v3147_v22  ;;  %v3218_v43 = vadd.f32 %v5460_v34, %v3148_v53 }
 0x265   : > { %3274 = vst [vmem:[%s5932_s4 + $0x10] sm:$0xff] %v3210_v20  ;;  %3275 = vst [vmem:[%s5932_s4 + $0x18] sm:$0xff] %v3211_v58  ;;  %v3219_v13 = vadd.f32 %v5460_v34, %v3149_v31  ;;  %v3220_v36 = vadd.f32 %v5460_v34, %v3150_v11  ;;  %v3221_v4 = vadd.f32 %v5460_v34, %v3151_v6  ;;  %v3101_v31 = vld [vmem:[%s5932_s4 + $0x108] sm:$0xff]  ;;  %v3102_v11 = vld [vmem:[%s5932_s4 + $0x110] sm:$0xff] }
 0x266   : > { %3276 = vst [vmem:[%s5932_s4 + $0x20] sm:$0xff] %v3212_v5  ;;  %3277 = vst [vmem:[%s5932_s4 + $0x28] sm:$0xff] %v3213_v16  ;;  %v3152_v41 = vmul.f32 %v5424_v46, %v3082_v15  ;;  %v3153_v60 = vmul.f32 %v5424_v46, %v3083_v38  ;;  %v3154_v50 = vmul.f32 %v5424_v46, %v3084_v39  ;;  %v3103_v6 = vld [vmem:[%s5932_s4 + $0x118] sm:$0xff]  ;;  %v3104_v15 = vld [vmem:[%s5932_s4 + $0x120] sm:$0xff] }
 0x267   : > { %3278 = vst [vmem:[%s5932_s4 + $0x30] sm:$0xff] %v3214_v44  ;;  %3279 = vst [vmem:[%s5932_s4 + $0x38] sm:$0xff] %v3215_v8  ;;  %v3155_v17 = vmul.f32 %v5424_v46, %v3085_v23  ;;  %v3156_v59 = vmul.f32 %v5424_v46, %v3086_v1  ;;  %v3157_v30 = vmul.f32 %v5424_v46, %v3087_v32  ;;  %v3105_v38 = vld [vmem:[%s5932_s4 + $0x128] sm:$0xff] }
 0x268   : > { %3280 = vst [vmem:[%s5932_s4 + $0x40] sm:$0xff] %v3216_v26  ;;  %3281 = vst [vmem:[%s5932_s4 + $0x48] sm:$0xff] %v3217_v25  ;;  %v3222_v28 = vadd.f32 %v5460_v34, %v3152_v41  ;;  %v3223_v62 = vadd.f32 %v5460_v34, %v3153_v60  ;;  %v3158_v27 = vmul.f32 %v5424_v46, %v3088_v49  ;;  %v3106_v26 = vld [vmem:[%s5932_s4 + $0x130] sm:$0xff]  ;;  %v3107_v25 = vld [vmem:[%s5932_s4 + $0x138] sm:$0xff] }
 0x269   : > { %3282 = vst [vmem:[%s5932_s4 + $0x50] sm:$0xff] %v3218_v43  ;;  %3283 = vst [vmem:[%s5932_s4 + $0x58] sm:$0xff] %v3219_v13  ;;  %v3159_v29 = vmul.f32 %v5424_v46, %v3089_v54  ;;  %v3224_v9 = vadd.f32 %v5460_v34, %v3154_v50  ;;  %v3225_v18 = vadd.f32 %v5460_v34, %v3155_v17  ;;  %v3108_v43 = vld [vmem:[%s5932_s4 + $0x140] sm:$0xff]  ;;  %v3110_v41 = vld [vmem:[%s5932_s4 + $0x150] sm:$0xff] }
 0x26a   : > { %3284 = vst [vmem:[%s5932_s4 + $0x60] sm:$0xff] %v3220_v36  ;;  %3285 = vst [vmem:[%s5932_s4 + $0x68] sm:$0xff] %v3221_v4  ;;  %v3226_v45 = vadd.f32 %v5460_v34, %v3156_v59  ;;  %v3227_v7 = vadd.f32 %v5460_v34, %v3157_v30  ;;  %v3228_v52 = vadd.f32 %v5460_v34, %v3158_v27  ;;  %v3109_v4 = vld [vmem:[%s5932_s4 + $0x148] sm:$0xff]  ;;  %v3111_v60 = vld [vmem:[%s5932_s4 + $0x158] sm:$0xff] }
 0x26b   : > { %3286 = vst [vmem:[%s5932_s4 + $0x70] sm:$0xff] %v3222_v28  ;;  %3287 = vst [vmem:[%s5932_s4 + $0x78] sm:$0xff] %v3223_v62  ;;  %v3229_v3 = vadd.f32 %v5460_v34, %v3159_v29  ;;  %v3160_v12 = vmul.f32 %v5424_v46, %v3090_v56  ;;  %v3161_v2 = vmul.f32 %v5424_v46, %v3091_v61  ;;  %v3112_v56 = vld [vmem:[%s5932_s4 + $0x160] sm:$0xff]  ;;  %v3113_v61 = vld [vmem:[%s5932_s4 + $0x168] sm:$0xff] }
 0x26c   : > { %3288 = vst [vmem:[%s5932_s4 + $0x80] sm:$0xff] %v3224_v9  ;;  %3289 = vst [vmem:[%s5932_s4 + $0x88] sm:$0xff] %v3225_v18  ;;  %v3162_v47 = vmul.f32 %v5424_v46, %v3092_v42  ;;  %v3163_v33 = vmul.f32 %v5424_v46, %v3093_v48  ;;  %v3164_v0 = vmul.f32 %v5424_v46, %v3094_v24  ;;  %v3114_v9 = vld [vmem:[%s5932_s4 + $0x170] sm:$0xff]  ;;  %v3115_v18 = vld [vmem:[%s5932_s4 + $0x178] sm:$0xff] }
 0x26d   : > { %3290 = vst [vmem:[%s5932_s4 + $0x90] sm:$0xff] %v3226_v45  ;;  %3291 = vst [vmem:[%s5932_s4 + $0x98] sm:$0xff] %v3227_v7  ;;  %v3165_v40 = vmul.f32 %v5424_v46, %v3095_v21  ;;  %v3230_v10 = vadd.f32 %v5460_v34, %v3160_v12  ;;  %v3231_v63 = vadd.f32 %v5460_v34, %v3161_v2  ;;  %v3116_v45 = vld [vmem:[%s5932_s4 + $0x180] sm:$0xff]  ;;  %v3118_v12 = vld [vmem:[%s5932_s4 + $0x190] sm:$0xff] }
 0x26e   : > { %3292 = vst [vmem:[%s5932_s4 + $0xa0] sm:$0xff] %v3228_v52  ;;  %3293 = vst [vmem:[%s5932_s4 + $0xa8] sm:$0xff] %v3229_v3  ;;  %v3166_v22 = vmul.f32 %v5424_v46, %v3096_v55  ;;  %v3167_v53 = vmul.f32 %v5424_v46, %v3097_v35  ;;  %v3232_v19 = vadd.f32 %v5460_v34, %v3162_v47  ;;  %v3117_v3 = vld [vmem:[%s5932_s4 + $0x188] sm:$0xff]  ;;  %v3119_v2 = vld [vmem:[%s5932_s4 + $0x198] sm:$0xff] }
 0x26f   : > { %v3233_v57 = vadd.f32 %v5460_v34, %v3163_v33  ;;  %v3234_v20 = vadd.f32 %v5460_v34, %v3164_v0  ;;  %v3235_v58 = vadd.f32 %v5460_v34, %v3165_v40  ;;  %3294 = vst [vmem:[%s5932_s4 + $0xb0] sm:$0xff] %v3230_v10  ;;  %3295 = vst [vmem:[%s5932_s4 + $0xb8] sm:$0xff] %v3231_v63 }
 0x270   : > { %v3236_v39 = vadd.f32 %v5460_v34, %v3166_v22  ;;  %v3237_v5 = vadd.f32 %v5460_v34, %v3167_v53  ;;  %v3168_v16 = vmul.f32 %v5424_v46, %v3098_v51  ;;  %v3169_v44 = vmul.f32 %v5424_v46, %v3099_v14  ;;  %3296 = vst [vmem:[%s5932_s4 + $0xc0] sm:$0xff] %v3232_v19  ;;  %v3120_v51 = vld [vmem:[%s5932_s4 + $0x1a0] sm:$0xff]  ;;  %v3121_v14 = vld [vmem:[%s5932_s4 + $0x1a8] sm:$0xff]  ;;  %v3122_v19 = vld [vmem:[%s5932_s4 + $0x1b0] sm:$0xff] }
 0x271   : > { %3297 = vst [vmem:[%s5932_s4 + $0xc8] sm:$0xff] %v3233_v57  ;;  %3298 = vst [vmem:[%s5932_s4 + $0xd0] sm:$0xff] %v3234_v20  ;;  %v3170_v8 = vmul.f32 %v5424_v46, %v3100_v37  ;;  %v3171_v23 = vmul.f32 %v5424_v46, %v3101_v31  ;;  %v3172_v1 = vmul.f32 %v5424_v46, %v3102_v11  ;;  %v3123_v57 = vld [vmem:[%s5932_s4 + $0x1b8] sm:$0xff]  ;;  %v3124_v20 = vld [vmem:[%s5932_s4 + $0x1c0] sm:$0xff] }
 0x272   : > { %3299 = vst [vmem:[%s5932_s4 + $0xd8] sm:$0xff] %v3235_v58  ;;  %v3173_v32 = vmul.f32 %v5424_v46, %v3103_v6  ;;  %3300 = vst [vmem:[%s5932_s4 + $0xe0] sm:$0xff] %v3236_v39  ;;  %v3238_v13 = vadd.f32 %v5460_v34, %v3168_v16  ;;  %v3239_v49 = vadd.f32 %v5460_v34, %v3169_v44  ;;  %v3126_v16 = vld [vmem:[%s5932_s4 + $0x1d0] sm:$0xff]  ;;  %v3127_v44 = vld [vmem:[%s5932_s4 + $0x1d8] sm:$0xff] }
 0x273   : > { %3301 = vst [vmem:[%s5932_s4 + $0xe8] sm:$0xff] %v3237_v5  ;;  %v3174_v54 = vmul.f32 %v5424_v46, %v3104_v15  ;;  %v3175_v36 = vmul.f32 %v5424_v46, %v3105_v38  ;;  %v3240_v50 = vadd.f32 %v5460_v34, %v3170_v8  ;;  %v3241_v17 = vadd.f32 %v5460_v34, %v3171_v23  ;;  %v3125_v5 = vld [vmem:[%s5932_s4 + $0x1c8] sm:$0xff] }
 0x274   : > { %v3242_v59 = vadd.f32 %v5460_v34, %v3172_v1  ;;  %v3243_v30 = vadd.f32 %v5460_v34, %v3173_v32  ;;  %3302 = vst [vmem:[%s5932_s4 + $0xf0] sm:$0xff] %v3238_v13  ;;  %3303 = vst [vmem:[%s5932_s4 + $0xf8] sm:$0xff] %v3239_v49  ;;  %v3176_v62 = vmul.f32 %v5424_v46, %v3106_v26  ;;  %v3128_v26 = vld [vmem:[%s5932_s4 + $0x1e0] sm:$0xff] }
 0x275   : > { %v3244_v42 = vadd.f32 %v5460_v34, %v3174_v54  ;;  %v3245_v28 = vadd.f32 %v5460_v34, %v3175_v36  ;;  %v3177_v27 = vmul.f32 %v5424_v46, %v3107_v25  ;;  %3304 = vst [vmem:[%s5932_s4 + $0x100] sm:$0xff] %v3240_v50  ;;  %3305 = vst [vmem:[%s5932_s4 + $0x108] sm:$0xff] %v3241_v17  ;;  %v3129_v25 = vld [vmem:[%s5932_s4 + $0x1e8] sm:$0xff]  ;;  %v3130_v50 = vld [vmem:[%s5932_s4 + $0x1f0] sm:$0xff] }
 0x276   : > { %3306 = vst [vmem:[%s5932_s4 + $0x110] sm:$0xff] %v3242_v59  ;;  %3307 = vst [vmem:[%s5932_s4 + $0x118] sm:$0xff] %v3243_v30  ;;  %v3178_v29 = vmul.f32 %v5424_v46, %v3108_v43  ;;  %v3179_v48 = vmul.f32 %v5424_v46, %v3109_v4  ;;  %v3180_v24 = vmul.f32 %v5424_v46, %v3110_v41  ;;  %v3131_v17 = vld [vmem:[%s5932_s4 + $0x1f8] sm:$0xff] }
 0x277   : > { %v3181_v21 = vmul.f32 %v5424_v46, %v3111_v60  ;;  %3308 = vst [vmem:[%s5932_s4 + $0x120] sm:$0xff] %v3244_v42  ;;  %3309 = vst [vmem:[%s5932_s4 + $0x128] sm:$0xff] %v3245_v28  ;;  %v3246_v7 = vadd.f32 %v5460_v34, %v3176_v62  ;;  %v3247_v55 = vadd.f32 %v5460_v34, %v3177_v27 }
 0x278   : > { %v3182_v35 = vmul.f32 %v5424_v46, %v3112_v56  ;;  %v3183_v52 = vmul.f32 %v5424_v46, %v3113_v61  ;;  %v3248_v47 = vadd.f32 %v5460_v34, %v3178_v29  ;;  %v3249_v33 = vadd.f32 %v5460_v34, %v3179_v48 }
 0x279   : > { %v3250_v0 = vadd.f32 %v5460_v34, %v3180_v24  ;;  %v3251_v40 = vadd.f32 %v5460_v34, %v3181_v21  ;;  %3310 = vst [vmem:[%s5932_s4 + $0x130] sm:$0xff] %v3246_v7  ;;  %3311 = vst [vmem:[%s5932_s4 + $0x138] sm:$0xff] %v3247_v55  ;;  %v3184_v63 = vmul.f32 %v5424_v46, %v3114_v9 }
 0x27a   : > { %v3252_v37 = vadd.f32 %v5460_v34, %v3182_v35  ;;  %v3253_v10 = vadd.f32 %v5460_v34, %v3183_v52  ;;  %v3185_v22 = vmul.f32 %v5424_v46, %v3115_v18  ;;  %3312 = vst [vmem:[%s5932_s4 + $0x140] sm:$0xff] %v3248_v47  ;;  %3313 = vst [vmem:[%s5932_s4 + $0x148] sm:$0xff] %v3249_v33 }
 0x27b   : > { %3314 = vst [vmem:[%s5932_s4 + $0x150] sm:$0xff] %v3250_v0  ;;  %3315 = vst [vmem:[%s5932_s4 + $0x158] sm:$0xff] %v3251_v40  ;;  %v3186_v53 = vmul.f32 %v5424_v46, %v3116_v45  ;;  %v3187_v31 = vmul.f32 %v5424_v46, %v3117_v3  ;;  %v3188_v11 = vmul.f32 %v5424_v46, %v3118_v12 }
 0x27c   : > { %v3189_v6 = vmul.f32 %v5424_v46, %v3119_v2  ;;  %3316 = vst [vmem:[%s5932_s4 + $0x160] sm:$0xff] %v3252_v37  ;;  %3317 = vst [vmem:[%s5932_s4 + $0x168] sm:$0xff] %v3253_v10  ;;  %v3254_v58 = vadd.f32 %v5460_v34, %v3184_v63  ;;  %v3255_v15 = vadd.f32 %v5460_v34, %v3185_v22 }
 0x27d   : > { %v3190_v38 = vmul.f32 %v5424_v46, %v3120_v51  ;;  %v3191_v39 = vmul.f32 %v5424_v46, %v3121_v14  ;;  %v3256_v8 = vadd.f32 %v5460_v34, %v3186_v53  ;;  %v3257_v23 = vadd.f32 %v5460_v34, %v3187_v31 }
 0x27e   : > { %v3258_v1 = vadd.f32 %v5460_v34, %v3188_v11  ;;  %v3259_v32 = vadd.f32 %v5460_v34, %v3189_v6  ;;  %3318 = vst [vmem:[%s5932_s4 + $0x170] sm:$0xff] %v3254_v58  ;;  %3319 = vst [vmem:[%s5932_s4 + $0x178] sm:$0xff] %v3255_v15  ;;  %v3192_v49 = vmul.f32 %v5424_v46, %v3122_v19 }
 0x27f   : > { %v3260_v43 = vadd.f32 %v5460_v34, %v3190_v38  ;;  %v3261_v13 = vadd.f32 %v5460_v34, %v3191_v39  ;;  %v3193_v54 = vmul.f32 %v5424_v46, %v3123_v57  ;;  %3320 = vst [vmem:[%s5932_s4 + $0x180] sm:$0xff] %v3256_v8  ;;  %3321 = vst [vmem:[%s5932_s4 + $0x188] sm:$0xff] %v3257_v23 }
 0x280   : > { %3322 = vst [vmem:[%s5932_s4 + $0x190] sm:$0xff] %v3258_v1  ;;  %3323 = vst [vmem:[%s5932_s4 + $0x198] sm:$0xff] %v3259_v32  ;;  %v3194_v36 = vmul.f32 %v5424_v46, %v3124_v20  ;;  %v3195_v4 = vmul.f32 %v5424_v46, %v3125_v5  ;;  %v3196_v41 = vmul.f32 %v5424_v46, %v3126_v16 }
 0x281   : > { %v3197_v60 = vmul.f32 %v5424_v46, %v3127_v44  ;;  %3324 = vst [vmem:[%s5932_s4 + $0x1a0] sm:$0xff] %v3260_v43  ;;  %3325 = vst [vmem:[%s5932_s4 + $0x1a8] sm:$0xff] %v3261_v13  ;;  %v3262_v59 = vadd.f32 %v5460_v34, %v3192_v49  ;;  %v3263_v30 = vadd.f32 %v5460_v34, %v3193_v54 }
 0x282   : > { %v3198_v56 = vmul.f32 %v5424_v46, %v3128_v26  ;;  %v3199_v61 = vmul.f32 %v5424_v46, %v3129_v25  ;;  %v3264_v42 = vadd.f32 %v5460_v34, %v3194_v36  ;;  %v3265_v28 = vadd.f32 %v5460_v34, %v3195_v4 }
 0x283   : > { %v3266_v62 = vadd.f32 %v5460_v34, %v3196_v41  ;;  %v3267_v27 = vadd.f32 %v5460_v34, %v3197_v60  ;;  %3326 = vst [vmem:[%s5932_s4 + $0x1b0] sm:$0xff] %v3262_v59  ;;  %3327 = vst [vmem:[%s5932_s4 + $0x1b8] sm:$0xff] %v3263_v30  ;;  %v3200_v24 = vmul.f32 %v5424_v46, %v3130_v50 }
 0x284   : > { %v3268_v29 = vadd.f32 %v5460_v34, %v3198_v56  ;;  %v3269_v48 = vadd.f32 %v5460_v34, %v3199_v61  ;;  %v3201_v21 = vmul.f32 %v5424_v46, %v3131_v17  ;;  %3328 = vst [vmem:[%s5932_s4 + $0x1c0] sm:$0xff] %v3264_v42  ;;  %3329 = vst [vmem:[%s5932_s4 + $0x1c8] sm:$0xff] %v3265_v28 }
 0x285   : > { %3330 = vst [vmem:[%s5932_s4 + $0x1d0] sm:$0xff] %v3266_v62  ;;  %3331 = vst [vmem:[%s5932_s4 + $0x1d8] sm:$0xff] %v3267_v27  ;;  %v3270_v46 = vadd.f32 %v5460_v34, %v3200_v24 }
 0x286   : > { %3332 = vst [vmem:[%s5932_s4 + $0x1e0] sm:$0xff] %v3268_v29  ;;  %3333 = vst [vmem:[%s5932_s4 + $0x1e8] sm:$0xff] %v3269_v48  ;;  %v3271_v9 = vadd.f32 %v5460_v34, %v3201_v21 }
 0x287   : > { %3334 = vst [vmem:[%s5932_s4 + $0x1f0] sm:$0xff] %v3270_v46 }
 0x288   : > { %3335 = vst [vmem:[%s5932_s4 + $0x1f8] sm:$0xff] %v3271_v9 }
 0x289 PF: > { %s14_s15 = sadd.s32 1, %s4367_s15  }
 0x28a   : > { %p11_p6 = scmp.ge.s32.totalorder %s14_s15, 4  }
 0x28c   :  { %13 = sbr.rel (!%p11_p6) target bundleno = 1 (0x1), region = 79 }

</bundles_post_ra>
